<compile_context>
chip_gen: v7x
topology: tpu7x:2x2x1
jax: 0.10.0
libtpu: 0.0.40
codegen_flags: <defaults>
</compile_context>

<pallas_src>
import jax
import jax.numpy as jnp
from jax import lax
from jax.experimental import pallas as pl
from jax.experimental.pallas import tpu as pltpu

# ---- model dimensions (from the PyTorch module) ----
G = 3
N = 16          # sequence length == BatchNorm1d(N) channel count
B = 2           # batch size
EPS = 1e-5

K1, K2, K3 = 11, 5, 3
C0, C1, C2, C3 = 2, 128, 64, 32
PAD1 = K1 // 2                      # widest conv padding, applied in wrapper

# ---- packed-weight layout: rows of a (W_ROWS, 128) f32 slab (8-aligned) ----
W1_R, W1_N = 0, K1 * C0             # (22, 128)
W2_R, W2_N = 24, K2 * C1            # (640, 64)
W3_R, W3_N = 664, K3 * C2           # (192, 32)
WS_R, WS_N = 856, 1 * C0            # (2, 32)
WL_R, WL_N = 864, C3                # (32, 6)
W_ROWS = 896

# ---- packed-vector layout: rows of a (16, 128) f32 slab ----
#  0:b1  1:g1  2:be1   3:b2  4:g2  5:be2   6:b3  7:g3  8:be3
#  9:bs 10:gs 11:bes  12:bl 13:gtd 14:betd


def encoder_kernel(x_ref, wp_ref, vp_ref, out_ref):
    Bb, Lp, _ = x_ref.shape
    L = Lp - 2 * PAD1
    R = Bb * L                                      # batch*length rows (32)

    xp = x_ref[...]                                 # (B, L+10, 2) f32

    def taps(x3, K):
        # x3: (B, L+K-1, C) already padded -> (B*L, K*C) im2col matrix,
        # feature order k*C + c (matches the (K*Cin, Cout) packed weights).
        cols = [x3[:, k:k + L, :] for k in range(K)]
        return jnp.concatenate(cols, axis=-1).reshape(R, -1)

    def pad_len(x3, p):
        z = jnp.zeros((Bb, p, x3.shape[-1]), jnp.float32)
        return jnp.concatenate([z, x3, z], axis=1)

    def bn(x2d, g, b):
        # training-mode BatchNorm over rows (batch*length), per channel
        mean = jnp.mean(x2d, axis=0, keepdims=True)
        var = jnp.mean(jnp.square(x2d - mean), axis=0, keepdims=True)
        return (x2d - mean) * lax.rsqrt(var + EPS) * g + b

    # ---------------- encoder branch ----------------
    # Conv1d(2, 128, 11, pad=5): one (32,22)x(22,128) matmul
    xs1 = taps(xp, K1)                                              # (32, 22)
    h = jnp.dot(xs1, wp_ref[W1_R:W1_R + W1_N, :C1],
                preferred_element_type=jnp.float32) + vp_ref[0:1, :C1]
    h = jnp.maximum(bn(h, vp_ref[1:2, :C1], vp_ref[2:3, :C1]), 0.0)

    # Conv1d(128, 64, 5, pad=2): one (32,640)x(640,64) matmul
    xs2 = taps(pad_len(h.reshape(Bb, L, C1), K2 // 2), K2)          # (32, 640)
    h = jnp.dot(xs2, wp_ref[W2_R:W2_R + W2_N, :C2],
                preferred_element_type=jnp.float32) + vp_ref[3:4, :C2]
    h = jnp.maximum(bn(h, vp_ref[4:5, :C2], vp_ref[5:6, :C2]), 0.0)

    # Conv1d(64, 32, 3, pad=1): one (32,192)x(192,32) matmul
    xs3 = taps(pad_len(h.reshape(Bb, L, C2), K3 // 2), K3)          # (32, 192)
    h = jnp.dot(xs3, wp_ref[W3_R:W3_R + W3_N, :C3],
                preferred_element_type=jnp.float32) + vp_ref[6:7, :C3]
    h = bn(h, vp_ref[7:8, :C3], vp_ref[8:9, :C3])

    # ---------------- shortcut branch: Conv1d(2, 32, 1) -> BN ----------------
    # The center tap (k=5) of xs1 is exactly the un-padded input rows.
    x0 = xs1[:, (K1 // 2) * C0:(K1 // 2) * C0 + C0]                 # (32, 2)
    sc = jnp.dot(x0, wp_ref[WS_R:WS_R + WS_N, :C3],
                 preferred_element_type=jnp.float32) + vp_ref[9:10, :C3]
    sc = bn(sc, vp_ref[10:11, :C3], vp_ref[11:12, :C3])

    # ------ timedis: ReLU -> TimeDistributed(Linear(32,2G)) -> BatchNorm1d(N) ------
    t = jnp.maximum(h + sc, 0.0)                                    # (32, 32)
    y = jnp.dot(t, wp_ref[WL_R:WL_R + WL_N, :2 * G],
                preferred_element_type=jnp.float32) + vp_ref[12:13, :2 * G]
    y3 = y.reshape(Bb, L, 2 * G)                                    # (B, N, 2G)
    mean = jnp.mean(y3, axis=(0, 2), keepdims=True)                 # (1, N, 1)
    var = jnp.mean(jnp.square(y3 - mean), axis=(0, 2), keepdims=True)
    y3 = (y3 - mean) * lax.rsqrt(var + EPS) \
        * vp_ref[13:14, :L].reshape(1, L, 1) + vp_ref[14:15, :L].reshape(1, L, 1)

    out_ref[...] = y3


# ----------------------------- host-side helpers -----------------------------

def init_params(key):
    """Deterministic parameters matching the PyTorch module's shapes.

    Conv weights stored as (K, Cin, Cout) (PyTorch: (Cout, Cin, K)),
    linear weight as (in, out) (PyTorch: (out, in)), biases/BN params as (1, C).
    """
    ks = jax.random.split(key, 20)

    def nrm(k, shape, scale):
        return (scale * jax.random.normal(k, shape)).astype(jnp.float32)

    p = {}
    p["w1"] = nrm(ks[0], (K1, C0, C1), 0.15); p["b1"] = nrm(ks[1], (1, C1), 0.05)
    p["w2"] = nrm(ks[2], (K2, C1, C2), 0.05); p["b2"] = nrm(ks[3], (1, C2), 0.05)
    p["w3"] = nrm(ks[4], (K3, C2, C3), 0.08); p["b3"] = nrm(ks[5], (1, C3), 0.05)
    p["ws"] = nrm(ks[6], (1, C0, C3), 0.3);   p["bs"] = nrm(ks[7], (1, C3), 0.05)
    p["wl"] = nrm(ks[8], (C3, 2 * G), 0.15);  p["bl"] = nrm(ks[9], (1, 2 * G), 0.05)
    p["g1"] = 1.0 + nrm(ks[10], (1, C1), 0.05);  p["be1"] = nrm(ks[11], (1, C1), 0.05)
    p["g2"] = 1.0 + nrm(ks[12], (1, C2), 0.05);  p["be2"] = nrm(ks[13], (1, C2), 0.05)
    p["g3"] = 1.0 + nrm(ks[14], (1, C3), 0.05);  p["be3"] = nrm(ks[15], (1, C3), 0.05)
    p["gs"] = 1.0 + nrm(ks[16], (1, C3), 0.05);  p["bes"] = nrm(ks[17], (1, C3), 0.05)
    p["gtd"] = 1.0 + nrm(ks[18], (1, N), 0.05);  p["betd"] = nrm(ks[19], (1, N), 0.05)
    return p


def pack_params(p):
    """Pack all 20 params into a (896,128) weight slab and a (16,128) vector slab."""
    def w2d(w):   # (K, Cin, Cout) -> (K*Cin, Cout), row index = k*Cin + c
        K, Cin, Cout = w.shape
        return w.reshape(K * Cin, Cout).astype(jnp.float32)

    wp = jnp.zeros((W_ROWS, 128), jnp.float32)
    wp = wp.at[W1_R:W1_R + W1_N, :C1].set(w2d(p["w1"]))
    wp = wp.at[W2_R:W2_R + W2_N, :C2].set(w2d(p["w2"]))
    wp = wp.at[W3_R:W3_R + W3_N, :C3].set(w2d(p["w3"]))
    wp = wp.at[WS_R:WS_R + WS_N, :C3].set(w2d(p["ws"]))
    wp = wp.at[WL_R:WL_R + WL_N, :2 * G].set(p["wl"].astype(jnp.float32))

    vp = jnp.zeros((16, 128), jnp.float32)
    rows = [("b1", 0, C1), ("g1", 1, C1), ("be1", 2, C1),
            ("b2", 3, C2), ("g2", 4, C2), ("be2", 5, C2),
            ("b3", 6, C3), ("g3", 7, C3), ("be3", 8, C3),
            ("bs", 9, C3), ("gs", 10, C3), ("bes", 11, C3),
            ("bl", 12, 2 * G), ("gtd", 13, N), ("betd", 14, N)]
    for name, r, c in rows:
        vp = vp.at[r:r + 1, :c].set(p[name].astype(jnp.float32))
    return wp, vp


@jax.jit
def encoder_forward(x_ncl, w_packed, v_packed):
    """x_ncl: (B, 2, N) like the PyTorch module input. Returns (B, 2, N*G)."""
    B_, _, L_ = x_ncl.shape
    # One tiny fused XLA preprocessing op: NCL->NLC transpose + one-time pad=5.
    x_blc = jnp.transpose(x_ncl, (0, 2, 1)).astype(jnp.float32)     # (B, N, 2)
    xp = jnp.pad(x_blc, ((0, 0), (PAD1, PAD1), (0, 0)))             # (B, N+10, 2)

    vmem_spec = pl.BlockSpec(memory_space=pltpu.MemorySpace.VMEM)
    out = pl.pallas_call(
        encoder_kernel,
        out_shape=jax.ShapeDtypeStruct((B_, L_, 2 * G), jnp.float32),
        in_specs=[vmem_spec, vmem_spec, vmem_spec],
        out_specs=vmem_spec,
        cost_estimate=pl.CostEstimate(flops=3_260_000, transcendentals=280,
                                      bytes_accessed=468_128),
    )(xp, w_packed, v_packed)

    # PyTorch final .reshape(x.shape[0], 2, -1) — layout-preserving, free in XLA.
    return out.reshape(B_, 2, -1)


def encoder_reference(x_ncl, p):
    """Pure-JAX reference (same training-mode-BN semantics) for validation."""
    x = jnp.transpose(x_ncl, (0, 2, 1)).astype(jnp.float32)         # (B, N, 2)
    L_ = x.shape[1]

    def conv(x3, w, b):
        K = w.shape[0]
        pad = K // 2
        xpp = jnp.pad(x3, ((0, 0), (pad, pad), (0, 0)))
        out = sum(jnp.einsum("blc,co->blo", xpp[:, k:k + L_, :], w[k])
                  for k in range(K))
        return out + b.reshape(1, 1, -1)

    def bn_last(x3, g, b):
        m = jnp.mean(x3, axis=(0, 1), keepdims=True)
        v = jnp.mean(jnp.square(x3 - m), axis=(0, 1), keepdims=True)
        return (x3 - m) * lax.rsqrt(v + EPS) * g.reshape(1, 1, -1) + b.reshape(1, 1, -1)

    h = jax.nn.relu(bn_last(conv(x, p["w1"], p["b1"]), p["g1"], p["be1"]))
    h = jax.nn.relu(bn_last(conv(h, p["w2"], p["b2"]), p["g2"], p["be2"]))
    h = bn_last(conv(h, p["w3"], p["b3"]), p["g3"], p["be3"])
    sc = bn_last(conv(x, p["ws"], p["bs"]), p["gs"], p["bes"])
    t = jax.nn.relu(h + sc)                                         # (B, N, 32)
    y = jnp.einsum("blc,co->blo", t, p["wl"]) + p["bl"].reshape(1, 1, -1)
    m = jnp.mean(y, axis=(0, 2), keepdims=True)
    v = jnp.mean(jnp.square(y - m), axis=(0, 2), keepdims=True)
    y = (y - m) * lax.rsqrt(v + EPS) * p["gtd"].reshape(1, -1, 1) \
        + p["betd"].reshape(1, -1, 1)
    return y.reshape(x_ncl.shape[0], 2, -1)


if __name__ == "__main__":
    key = jax.random.PRNGKey(0)
    kx, kp = jax.random.split(key)
    x = jax.random.normal(kx, (B, 2, N), dtype=jnp.float32)   # PyTorch NCL input
    params = init_params(kp)
    w_packed, v_packed = pack_params(params)                  # packed once, reused

    y = encoder_forward(x, w_packed, v_packed)
    jax.block_until_ready(y)
    assert y.shape == (B, 2, N * G), y.shape

    # Correctness check against the pure-JAX reference (both f32, train-mode BN).
    y_ref = encoder_reference(x, params)
    err = float(jnp.max(jnp.abs(y - y_ref)))
    assert err < 5e-3, f"max abs error vs reference: {err}"

    print("KERNEL_OK")
</pallas_src>

<mosaic_0001>
module attributes {stable_mosaic.version = 11 : i64} {
  func.func @encoder_kernel(%arg0: memref<2x26x2xf32, #tpu.memory_space<vmem>>, %arg1: memref<896x128xf32, #tpu.memory_space<vmem>>, %arg2: memref<16x128xf32, #tpu.memory_space<vmem>>, %arg3: memref<2x16x6xf32, #tpu.memory_space<vmem>>) attributes {dimension_semantics = [], scalar_prefetch = 0 : i64, scratch_operands = 0 : i64, tpu.core_type = #tpu.core_type<tc>} {
    %c0 = arith.constant 0 : index
    %c0_0 = arith.constant 0 : index
    %c0_1 = arith.constant 0 : index
    %0 = vector.load %arg0[%c0, %c0_0, %c0_1] : memref<2x26x2xf32, #tpu.memory_space<vmem>>, vector<2x26x2xf32>
    %1 = vector.extract_strided_slice %0 {offsets = [0, 0, 0], sizes = [2, 16, 2], strides = [1, 1, 1]} : vector<2x26x2xf32> to vector<2x16x2xf32>
    %2 = vector.extract_strided_slice %0 {offsets = [0, 1, 0], sizes = [2, 16, 2], strides = [1, 1, 1]} : vector<2x26x2xf32> to vector<2x16x2xf32>
    %3 = vector.extract_strided_slice %0 {offsets = [0, 2, 0], sizes = [2, 16, 2], strides = [1, 1, 1]} : vector<2x26x2xf32> to vector<2x16x2xf32>
    %4 = vector.extract_strided_slice %0 {offsets = [0, 3, 0], sizes = [2, 16, 2], strides = [1, 1, 1]} : vector<2x26x2xf32> to vector<2x16x2xf32>
    %5 = vector.extract_strided_slice %0 {offsets = [0, 4, 0], sizes = [2, 16, 2], strides = [1, 1, 1]} : vector<2x26x2xf32> to vector<2x16x2xf32>
    %6 = vector.extract_strided_slice %0 {offsets = [0, 5, 0], sizes = [2, 16, 2], strides = [1, 1, 1]} : vector<2x26x2xf32> to vector<2x16x2xf32>
    %7 = vector.extract_strided_slice %0 {offsets = [0, 6, 0], sizes = [2, 16, 2], strides = [1, 1, 1]} : vector<2x26x2xf32> to vector<2x16x2xf32>
    %8 = vector.extract_strided_slice %0 {offsets = [0, 7, 0], sizes = [2, 16, 2], strides = [1, 1, 1]} : vector<2x26x2xf32> to vector<2x16x2xf32>
    %9 = vector.extract_strided_slice %0 {offsets = [0, 8, 0], sizes = [2, 16, 2], strides = [1, 1, 1]} : vector<2x26x2xf32> to vector<2x16x2xf32>
    %10 = vector.extract_strided_slice %0 {offsets = [0, 9, 0], sizes = [2, 16, 2], strides = [1, 1, 1]} : vector<2x26x2xf32> to vector<2x16x2xf32>
    %11 = vector.extract_strided_slice %0 {offsets = [0, 10, 0], sizes = [2, 16, 2], strides = [1, 1, 1]} : vector<2x26x2xf32> to vector<2x16x2xf32>
    %12 = tpu.concatenate %1, %2, %3, %4, %5, %6, %7, %8, %9, %10, %11 in 2 : vector<2x16x2xf32>, vector<2x16x2xf32>, vector<2x16x2xf32>, vector<2x16x2xf32>, vector<2x16x2xf32>, vector<2x16x2xf32>, vector<2x16x2xf32>, vector<2x16x2xf32>, vector<2x16x2xf32>, vector<2x16x2xf32>, vector<2x16x2xf32> -> vector<2x16x22xf32>
    %13 = vector.shape_cast %12 : vector<2x16x22xf32> to vector<32x22xf32>
    %c0_2 = arith.constant 0 : index
    %c0_3 = arith.constant 0 : index
    %14 = vector.load %arg1[%c0_2, %c0_3] : memref<896x128xf32, #tpu.memory_space<vmem>>, vector<22x128xf32>
    %cst = arith.constant dense<0.000000e+00> : vector<32x128xf32>
    %15 = tpu.matmul %13, %14, %cst {dimension_numbers = #tpu.dot_dimension_numbers<[1], [0], [0], [1], [0, 0, 1, 1], [], []>} : vector<32x22xf32>, vector<22x128xf32>, vector<32x128xf32> -> vector<32x128xf32>
    %c0_4 = arith.constant 0 : index
    %c0_5 = arith.constant 0 : index
    %16 = vector.load %arg2[%c0_4, %c0_5] : memref<16x128xf32, #tpu.memory_space<vmem>>, vector<1x128xf32>
    %17 = vector.broadcast %16 : vector<1x128xf32> to vector<32x128xf32>
    %18 = arith.addf %15, %17 : vector<32x128xf32>
    %c1 = arith.constant 1 : index
    %c0_6 = arith.constant 0 : index
    %19 = vector.load %arg2[%c1, %c0_6] : memref<16x128xf32, #tpu.memory_space<vmem>>, vector<1x128xf32>
    %c2 = arith.constant 2 : index
    %c0_7 = arith.constant 0 : index
    %20 = vector.load %arg2[%c2, %c0_7] : memref<16x128xf32, #tpu.memory_space<vmem>>, vector<1x128xf32>
    %cst_8 = arith.constant dense<0.000000e+00> : vector<128xf32>
    %21 = vector.multi_reduction <add>, %18, %cst_8 [0] : vector<32x128xf32> to vector<128xf32>
    %22 = vector.shape_cast %21 : vector<128xf32> to vector<1x128xf32>
    %cst_9 = arith.constant 3.200000e+01 : f32
    %23 = vector.broadcast %cst_9 : f32 to vector<1x128xf32>
    %24 = arith.divf %22, %23 : vector<1x128xf32>
    %25 = vector.broadcast %24 : vector<1x128xf32> to vector<32x128xf32>
    %26 = arith.subf %18, %25 : vector<32x128xf32>
    %27 = arith.mulf %26, %26 : vector<32x128xf32>
    %cst_10 = arith.constant dense<0.000000e+00> : vector<128xf32>
    %28 = vector.multi_reduction <add>, %27, %cst_10 [0] : vector<32x128xf32> to vector<128xf32>
    %29 = vector.shape_cast %28 : vector<128xf32> to vector<1x128xf32>
    %cst_11 = arith.constant 3.200000e+01 : f32
    %30 = vector.broadcast %cst_11 : f32 to vector<1x128xf32>
    %31 = arith.divf %29, %30 : vector<1x128xf32>
    %32 = vector.broadcast %24 : vector<1x128xf32> to vector<32x128xf32>
    %33 = arith.subf %18, %32 : vector<32x128xf32>
    %cst_12 = arith.constant 9.99999974E-6 : f32
    %34 = vector.broadcast %cst_12 : f32 to vector<1x128xf32>
    %35 = arith.addf %31, %34 : vector<1x128xf32>
    %36 = math.rsqrt %35 : vector<1x128xf32>
    %37 = vector.broadcast %36 : vector<1x128xf32> to vector<32x128xf32>
    %38 = arith.mulf %33, %37 : vector<32x128xf32>
    %39 = vector.broadcast %19 : vector<1x128xf32> to vector<32x128xf32>
    %40 = arith.mulf %38, %39 : vector<32x128xf32>
    %41 = vector.broadcast %20 : vector<1x128xf32> to vector<32x128xf32>
    %42 = arith.addf %40, %41 : vector<32x128xf32>
    %cst_13 = arith.constant 0.000000e+00 : f32
    %43 = vector.broadcast %cst_13 : f32 to vector<32x128xf32>
    %44 = arith.maximumf %42, %43 : vector<32x128xf32>
    %45 = vector.shape_cast %44 : vector<32x128xf32> to vector<2x16x128xf32>
    %cst_14 = arith.constant 0.000000e+00 : f32
    %46 = vector.broadcast %cst_14 : f32 to vector<2x2x128xf32>
    %47 = tpu.concatenate %46, %45, %46 in 1 : vector<2x2x128xf32>, vector<2x16x128xf32>, vector<2x2x128xf32> -> vector<2x20x128xf32>
    %48 = vector.extract_strided_slice %47 {offsets = [0, 0, 0], sizes = [2, 16, 128], strides = [1, 1, 1]} : vector<2x20x128xf32> to vector<2x16x128xf32>
    %49 = vector.extract_strided_slice %47 {offsets = [0, 1, 0], sizes = [2, 16, 128], strides = [1, 1, 1]} : vector<2x20x128xf32> to vector<2x16x128xf32>
    %50 = vector.extract_strided_slice %47 {offsets = [0, 2, 0], sizes = [2, 16, 128], strides = [1, 1, 1]} : vector<2x20x128xf32> to vector<2x16x128xf32>
    %51 = vector.extract_strided_slice %47 {offsets = [0, 3, 0], sizes = [2, 16, 128], strides = [1, 1, 1]} : vector<2x20x128xf32> to vector<2x16x128xf32>
    %52 = vector.extract_strided_slice %47 {offsets = [0, 4, 0], sizes = [2, 16, 128], strides = [1, 1, 1]} : vector<2x20x128xf32> to vector<2x16x128xf32>
    %53 = tpu.concatenate %48, %49, %50, %51, %52 in 2 : vector<2x16x128xf32>, vector<2x16x128xf32>, vector<2x16x128xf32>, vector<2x16x128xf32>, vector<2x16x128xf32> -> vector<2x16x640xf32>
    %54 = vector.shape_cast %53 : vector<2x16x640xf32> to vector<32x640xf32>
    %c24 = arith.constant 24 : index
    %c0_15 = arith.constant 0 : index
    %55 = vector.load %arg1[%c24, %c0_15] : memref<896x128xf32, #tpu.memory_space<vmem>>, vector<640x64xf32>
    %cst_16 = arith.constant dense<0.000000e+00> : vector<32x64xf32>
    %56 = tpu.matmul %54, %55, %cst_16 {dimension_numbers = #tpu.dot_dimension_numbers<[1], [0], [0], [1], [0, 0, 1, 1], [], []>} : vector<32x640xf32>, vector<640x64xf32>, vector<32x64xf32> -> vector<32x64xf32>
    %c3 = arith.constant 3 : index
    %c0_17 = arith.constant 0 : index
    %57 = vector.load %arg2[%c3, %c0_17] : memref<16x128xf32, #tpu.memory_space<vmem>>, vector<1x64xf32>
    %58 = vector.broadcast %57 : vector<1x64xf32> to vector<32x64xf32>
    %59 = arith.addf %56, %58 : vector<32x64xf32>
    %c4 = arith.constant 4 : index
    %c0_18 = arith.constant 0 : index
    %60 = vector.load %arg2[%c4, %c0_18] : memref<16x128xf32, #tpu.memory_space<vmem>>, vector<1x64xf32>
    %c5 = arith.constant 5 : index
    %c0_19 = arith.constant 0 : index
    %61 = vector.load %arg2[%c5, %c0_19] : memref<16x128xf32, #tpu.memory_space<vmem>>, vector<1x64xf32>
    %cst_20 = arith.constant dense<0.000000e+00> : vector<64xf32>
    %62 = vector.multi_reduction <add>, %59, %cst_20 [0] : vector<32x64xf32> to vector<64xf32>
    %63 = vector.shape_cast %62 : vector<64xf32> to vector<1x64xf32>
    %cst_21 = arith.constant 3.200000e+01 : f32
    %64 = vector.broadcast %cst_21 : f32 to vector<1x64xf32>
    %65 = arith.divf %63, %64 : vector<1x64xf32>
    %66 = vector.broadcast %65 : vector<1x64xf32> to vector<32x64xf32>
    %67 = arith.subf %59, %66 : vector<32x64xf32>
    %68 = arith.mulf %67, %67 : vector<32x64xf32>
    %cst_22 = arith.constant dense<0.000000e+00> : vector<64xf32>
    %69 = vector.multi_reduction <add>, %68, %cst_22 [0] : vector<32x64xf32> to vector<64xf32>
    %70 = vector.shape_cast %69 : vector<64xf32> to vector<1x64xf32>
    %cst_23 = arith.constant 3.200000e+01 : f32
    %71 = vector.broadcast %cst_23 : f32 to vector<1x64xf32>
    %72 = arith.divf %70, %71 : vector<1x64xf32>
    %73 = vector.broadcast %65 : vector<1x64xf32> to vector<32x64xf32>
    %74 = arith.subf %59, %73 : vector<32x64xf32>
    %cst_24 = arith.constant 9.99999974E-6 : f32
    %75 = vector.broadcast %cst_24 : f32 to vector<1x64xf32>
    %76 = arith.addf %72, %75 : vector<1x64xf32>
    %77 = math.rsqrt %76 : vector<1x64xf32>
    %78 = vector.broadcast %77 : vector<1x64xf32> to vector<32x64xf32>
    %79 = arith.mulf %74, %78 : vector<32x64xf32>
    %80 = vector.broadcast %60 : vector<1x64xf32> to vector<32x64xf32>
    %81 = arith.mulf %79, %80 : vector<32x64xf32>
    %82 = vector.broadcast %61 : vector<1x64xf32> to vector<32x64xf32>
    %83 = arith.addf %81, %82 : vector<32x64xf32>
    %cst_25 = arith.constant 0.000000e+00 : f32
    %84 = vector.broadcast %cst_25 : f32 to vector<32x64xf32>
    %85 = arith.maximumf %83, %84 : vector<32x64xf32>
    %86 = vector.shape_cast %85 : vector<32x64xf32> to vector<2x16x64xf32>
    %cst_26 = arith.constant 0.000000e+00 : f32
    %87 = vector.broadcast %cst_26 : f32 to vector<2x1x64xf32>
    %88 = tpu.concatenate %87, %86, %87 in 1 : vector<2x1x64xf32>, vector<2x16x64xf32>, vector<2x1x64xf32> -> vector<2x18x64xf32>
    %89 = vector.extract_strided_slice %88 {offsets = [0, 0, 0], sizes = [2, 16, 64], strides = [1, 1, 1]} : vector<2x18x64xf32> to vector<2x16x64xf32>
    %90 = vector.extract_strided_slice %88 {offsets = [0, 1, 0], sizes = [2, 16, 64], strides = [1, 1, 1]} : vector<2x18x64xf32> to vector<2x16x64xf32>
    %91 = vector.extract_strided_slice %88 {offsets = [0, 2, 0], sizes = [2, 16, 64], strides = [1, 1, 1]} : vector<2x18x64xf32> to vector<2x16x64xf32>
    %92 = tpu.concatenate %89, %90, %91 in 2 : vector<2x16x64xf32>, vector<2x16x64xf32>, vector<2x16x64xf32> -> vector<2x16x192xf32>
    %93 = vector.shape_cast %92 : vector<2x16x192xf32> to vector<32x192xf32>
    %c664 = arith.constant 664 : index
    %c0_27 = arith.constant 0 : index
    %94 = vector.load %arg1[%c664, %c0_27] : memref<896x128xf32, #tpu.memory_space<vmem>>, vector<192x32xf32>
    %cst_28 = arith.constant dense<0.000000e+00> : vector<32x32xf32>
    %95 = tpu.matmul %93, %94, %cst_28 {dimension_numbers = #tpu.dot_dimension_numbers<[1], [0], [0], [1], [0, 0, 1, 1], [], []>} : vector<32x192xf32>, vector<192x32xf32>, vector<32x32xf32> -> vector<32x32xf32>
    %c6 = arith.constant 6 : index
    %c0_29 = arith.constant 0 : index
    %96 = vector.load %arg2[%c6, %c0_29] : memref<16x128xf32, #tpu.memory_space<vmem>>, vector<1x32xf32>
    %97 = vector.broadcast %96 : vector<1x32xf32> to vector<32x32xf32>
    %98 = arith.addf %95, %97 : vector<32x32xf32>
    %c7 = arith.constant 7 : index
    %c0_30 = arith.constant 0 : index
    %99 = vector.load %arg2[%c7, %c0_30] : memref<16x128xf32, #tpu.memory_space<vmem>>, vector<1x32xf32>
    %c8 = arith.constant 8 : index
    %c0_31 = arith.constant 0 : index
    %100 = vector.load %arg2[%c8, %c0_31] : memref<16x128xf32, #tpu.memory_space<vmem>>, vector<1x32xf32>
    %cst_32 = arith.constant dense<0.000000e+00> : vector<32xf32>
    %101 = vector.multi_reduction <add>, %98, %cst_32 [0] : vector<32x32xf32> to vector<32xf32>
    %102 = vector.shape_cast %101 : vector<32xf32> to vector<1x32xf32>
    %cst_33 = arith.constant 3.200000e+01 : f32
    %103 = vector.broadcast %cst_33 : f32 to vector<1x32xf32>
    %104 = arith.divf %102, %103 : vector<1x32xf32>
    %105 = vector.broadcast %104 : vector<1x32xf32> to vector<32x32xf32>
    %106 = arith.subf %98, %105 : vector<32x32xf32>
    %107 = arith.mulf %106, %106 : vector<32x32xf32>
    %cst_34 = arith.constant dense<0.000000e+00> : vector<32xf32>
    %108 = vector.multi_reduction <add>, %107, %cst_34 [0] : vector<32x32xf32> to vector<32xf32>
    %109 = vector.shape_cast %108 : vector<32xf32> to vector<1x32xf32>
    %cst_35 = arith.constant 3.200000e+01 : f32
    %110 = vector.broadcast %cst_35 : f32 to vector<1x32xf32>
    %111 = arith.divf %109, %110 : vector<1x32xf32>
    %112 = vector.broadcast %104 : vector<1x32xf32> to vector<32x32xf32>
    %113 = arith.subf %98, %112 : vector<32x32xf32>
    %cst_36 = arith.constant 9.99999974E-6 : f32
    %114 = vector.broadcast %cst_36 : f32 to vector<1x32xf32>
    %115 = arith.addf %111, %114 : vector<1x32xf32>
    %116 = math.rsqrt %115 : vector<1x32xf32>
    %117 = vector.broadcast %116 : vector<1x32xf32> to vector<32x32xf32>
    %118 = arith.mulf %113, %117 : vector<32x32xf32>
    %119 = vector.broadcast %99 : vector<1x32xf32> to vector<32x32xf32>
    %120 = arith.mulf %118, %119 : vector<32x32xf32>
    %121 = vector.broadcast %100 : vector<1x32xf32> to vector<32x32xf32>
    %122 = arith.addf %120, %121 : vector<32x32xf32>
    %123 = vector.extract_strided_slice %13 {offsets = [0, 10], sizes = [32, 2], strides = [1, 1]} : vector<32x22xf32> to vector<32x2xf32>
    %c856 = arith.constant 856 : index
    %c0_37 = arith.constant 0 : index
    %124 = vector.load %arg1[%c856, %c0_37] : memref<896x128xf32, #tpu.memory_space<vmem>>, vector<2x32xf32>
    %cst_38 = arith.constant dense<0.000000e+00> : vector<32x32xf32>
    %125 = tpu.matmul %123, %124, %cst_38 {dimension_numbers = #tpu.dot_dimension_numbers<[1], [0], [0], [1], [0, 0, 1, 1], [], []>} : vector<32x2xf32>, vector<2x32xf32>, vector<32x32xf32> -> vector<32x32xf32>
    %c9 = arith.constant 9 : index
    %c0_39 = arith.constant 0 : index
    %126 = vector.load %arg2[%c9, %c0_39] : memref<16x128xf32, #tpu.memory_space<vmem>>, vector<1x32xf32>
    %127 = vector.broadcast %126 : vector<1x32xf32> to vector<32x32xf32>
    %128 = arith.addf %125, %127 : vector<32x32xf32>
    %c10 = arith.constant 10 : index
    %c0_40 = arith.constant 0 : index
    %129 = vector.load %arg2[%c10, %c0_40] : memref<16x128xf32, #tpu.memory_space<vmem>>, vector<1x32xf32>
    %c11 = arith.constant 11 : index
    %c0_41 = arith.constant 0 : index
    %130 = vector.load %arg2[%c11, %c0_41] : memref<16x128xf32, #tpu.memory_space<vmem>>, vector<1x32xf32>
    %cst_42 = arith.constant dense<0.000000e+00> : vector<32xf32>
    %131 = vector.multi_reduction <add>, %128, %cst_42 [0] : vector<32x32xf32> to vector<32xf32>
    %132 = vector.shape_cast %131 : vector<32xf32> to vector<1x32xf32>
    %cst_43 = arith.constant 3.200000e+01 : f32
    %133 = vector.broadcast %cst_43 : f32 to vector<1x32xf32>
    %134 = arith.divf %132, %133 : vector<1x32xf32>
    %135 = vector.broadcast %134 : vector<1x32xf32> to vector<32x32xf32>
    %136 = arith.subf %128, %135 : vector<32x32xf32>
    %137 = arith.mulf %136, %136 : vector<32x32xf32>
    %cst_44 = arith.constant dense<0.000000e+00> : vector<32xf32>
    %138 = vector.multi_reduction <add>, %137, %cst_44 [0] : vector<32x32xf32> to vector<32xf32>
    %139 = vector.shape_cast %138 : vector<32xf32> to vector<1x32xf32>
    %cst_45 = arith.constant 3.200000e+01 : f32
    %140 = vector.broadcast %cst_45 : f32 to vector<1x32xf32>
    %141 = arith.divf %139, %140 : vector<1x32xf32>
    %142 = vector.broadcast %134 : vector<1x32xf32> to vector<32x32xf32>
    %143 = arith.subf %128, %142 : vector<32x32xf32>
    %cst_46 = arith.constant 9.99999974E-6 : f32
    %144 = vector.broadcast %cst_46 : f32 to vector<1x32xf32>
    %145 = arith.addf %141, %144 : vector<1x32xf32>
    %146 = math.rsqrt %145 : vector<1x32xf32>
    %147 = vector.broadcast %146 : vector<1x32xf32> to vector<32x32xf32>
    %148 = arith.mulf %143, %147 : vector<32x32xf32>
    %149 = vector.broadcast %129 : vector<1x32xf32> to vector<32x32xf32>
    %150 = arith.mulf %148, %149 : vector<32x32xf32>
    %151 = vector.broadcast %130 : vector<1x32xf32> to vector<32x32xf32>
    %152 = arith.addf %150, %151 : vector<32x32xf32>
    %153 = arith.addf %122, %152 : vector<32x32xf32>
    %cst_47 = arith.constant 0.000000e+00 : f32
    %154 = vector.broadcast %cst_47 : f32 to vector<32x32xf32>
    %155 = arith.maximumf %153, %154 : vector<32x32xf32>
    %c864 = arith.constant 864 : index
    %c0_48 = arith.constant 0 : index
    %156 = vector.load %arg1[%c864, %c0_48] : memref<896x128xf32, #tpu.memory_space<vmem>>, vector<32x6xf32>
    %cst_49 = arith.constant dense<0.000000e+00> : vector<32x6xf32>
    %157 = tpu.matmul %155, %156, %cst_49 {dimension_numbers = #tpu.dot_dimension_numbers<[1], [0], [0], [1], [0, 0, 1, 1], [], []>} : vector<32x32xf32>, vector<32x6xf32>, vector<32x6xf32> -> vector<32x6xf32>
    %c12 = arith.constant 12 : index
    %c0_50 = arith.constant 0 : index
    %158 = vector.load %arg2[%c12, %c0_50] : memref<16x128xf32, #tpu.memory_space<vmem>>, vector<1x6xf32>
    %159 = vector.broadcast %158 : vector<1x6xf32> to vector<32x6xf32>
    %160 = arith.addf %157, %159 : vector<32x6xf32>
    %161 = vector.shape_cast %160 : vector<32x6xf32> to vector<2x16x6xf32>
    %cst_51 = arith.constant dense<0.000000e+00> : vector<16xf32>
    %162 = vector.multi_reduction <add>, %161, %cst_51 [0, 2] : vector<2x16x6xf32> to vector<16xf32>
    %163 = vector.shape_cast %162 : vector<16xf32> to vector<1x16x1xf32>
    %cst_52 = arith.constant 1.200000e+01 : f32
    %164 = vector.broadcast %cst_52 : f32 to vector<1x16x1xf32>
    %165 = arith.divf %163, %164 : vector<1x16x1xf32>
    %166 = vector.broadcast %165 : vector<1x16x1xf32> to vector<2x16x6xf32>
    %167 = arith.subf %161, %166 : vector<2x16x6xf32>
    %168 = arith.mulf %167, %167 : vector<2x16x6xf32>
    %cst_53 = arith.constant dense<0.000000e+00> : vector<16xf32>
    %169 = vector.multi_reduction <add>, %168, %cst_53 [0, 2] : vector<2x16x6xf32> to vector<16xf32>
    %170 = vector.shape_cast %169 : vector<16xf32> to vector<1x16x1xf32>
    %cst_54 = arith.constant 1.200000e+01 : f32
    %171 = vector.broadcast %cst_54 : f32 to vector<1x16x1xf32>
    %172 = arith.divf %170, %171 : vector<1x16x1xf32>
    %173 = vector.broadcast %165 : vector<1x16x1xf32> to vector<2x16x6xf32>
    %174 = arith.subf %161, %173 : vector<2x16x6xf32>
    %cst_55 = arith.constant 9.99999974E-6 : f32
    %175 = vector.broadcast %cst_55 : f32 to vector<1x16x1xf32>
    %176 = arith.addf %172, %175 : vector<1x16x1xf32>
    %177 = math.rsqrt %176 : vector<1x16x1xf32>
    %178 = vector.broadcast %177 : vector<1x16x1xf32> to vector<2x16x6xf32>
    %179 = arith.mulf %174, %178 : vector<2x16x6xf32>
    %c13 = arith.constant 13 : index
    %c0_56 = arith.constant 0 : index
    %180 = vector.load %arg2[%c13, %c0_56] : memref<16x128xf32, #tpu.memory_space<vmem>>, vector<1x16xf32>
    %181 = vector.shape_cast %180 : vector<1x16xf32> to vector<1x16x1xf32>
    %182 = vector.broadcast %181 : vector<1x16x1xf32> to vector<2x16x6xf32>
    %183 = arith.mulf %179, %182 : vector<2x16x6xf32>
    %c14 = arith.constant 14 : index
    %c0_57 = arith.constant 0 : index
    %184 = vector.load %arg2[%c14, %c0_57] : memref<16x128xf32, #tpu.memory_space<vmem>>, vector<1x16xf32>
    %185 = vector.shape_cast %184 : vector<1x16xf32> to vector<1x16x1xf32>
    %186 = vector.broadcast %185 : vector<1x16x1xf32> to vector<2x16x6xf32>
    %187 = arith.addf %183, %186 : vector<2x16x6xf32>
    %c0_58 = arith.constant 0 : index
    %c0_59 = arith.constant 0 : index
    %c0_60 = arith.constant 0 : index
    %188 = vector.load %arg3[%c0_58, %c0_59, %c0_60] : memref<2x16x6xf32, #tpu.memory_space<vmem>>, vector<2x16x6xf32>
    tpu.vector_store %arg3[%c0_58, %c0_59, %c0_60], %187 {strides = array<i32>} : memref<2x16x6xf32, #tpu.memory_space<vmem>>, vector<2x16x6xf32>,
    return
  }
}

</mosaic_0001>

<bundles_post_ra>
// kernel: encoder_forward.1
= control target key start
LH: loop header
LB: loop body
LE: loop exit
PB: predicated region body
PF: predicated region fallthrough
CT: control target
= control target key end

     0   :  { %8 = vsyncpa [#allocation3], 0  ;;  %s1996_s12 = smov [#allocation2]   ;;  %s2486_s0 = inlined_call_operand.vmem [shape: f32[2,26,2], index: 0, kind: input, shape index: {}]   ;;  %s2487_s1 = inlined_call_operand.hbm [shape: f32[896,128], index: 1, kind: input, shape index: {}]   ;;  %s2488_s2 = inlined_call_operand.vmem [shape: f32[16,128], index: 2, kind: input, shape index: {}]   ;;  %s2489_s3 = inlined_call_operand.vmem [shape: f32[2,16,6], index: 3, kind: output, shape index: {}]  }
   0x1   :  { %s16_s13 = sshll.u32 %s1996_s12, 4  ;;  %s1972_s16 = scalar_lea.hbm %s2487_s1, 14336  ;;  %s17_s13 = int_to_ptr.vmem [resolvable:$true] %s16_s13 }
   0x2   :  { %p1973_p0 = scmp.ne.s32.totalorder %s2487_s1, %s1972_s16  ;;  %p1976_p1 = scmp.lt.u32.totalorder %s1972_s16, %s2487_s1 }
   0x4   :  { %p1978_p2 = pnand %p1976_p1, %p1973_p0 }
   0x6   :  { %1981 = shalt.err (!%p1978_p2)
}
   0x7   :  { %s1982_s21 = scalar_lea.vmem %s17_s13, 14336  ;;  %p1987_p4 = scmp.lt.s32.totalorder %s17_s13, %s17_s13 }
   0x8   :  { %p1983_p3 = scmp.ne.s32.totalorder %s17_s13, %s1982_s21  ;;  %p1988_p5 = scmp.lt.s32.totalorder %s1982_s21, %s1982_s21 }
   0xa   :  { %p1989_p6 = por %p1988_p5, %p1987_p4 }
   0xc   :  { %p1990_p7 = pnand %p1989_p6, %p1983_p3 }
   0xe   :  { %1993 = shalt.err (!%p1990_p7)
}
   0xf   :  { %s1997_s22 = smov 128   ;;  %s1998_s23 = smov 8  }
  0x10   :  { %22 = dma.hbm_to_vmem [thread:$0]  %s2487_s1, 14336, %s17_s13, [#allocation3], %s1997_s22, %s1997_s22, %s1998_s23  }
  0x11   :  { %1994 = dma.done.wait [#allocation3], 14336  }
  0x12   :  { %1995 = vsyncadd [#allocation3], 4294952960  ;;  %v2047_v0 = vld [vmem:[%s2486_s0] sm:$0xff]  ;;  %v2052_v1 = vld [vmem:[%s2486_s0 + $0x8] sm:$0xff]  ;;  %vm65_vm0 = vcmask 1045504   ;;  %vm42_vm1 = vcmask 1046528  }
  0x13   :  { %v2057_v2 = vld [vmem:[%s2486_s0 + $0x10] sm:$0xff]  ;;  %v66_v3 = vrot.slane %v2047_v0, 2  ;;  %v67_v4 = vrot.slane %v2052_v1, 2  ;;  %v43_v5 = vrot.slane %v2047_v0, 1  ;;  %v44_v6 = vrot.slane %v2052_v1, 1  ;;  %s1999_s1 = smov 4  }
  0x14   :  { %v69_v7 = vrot.slane %v2057_v2, 2  ;;  %v46_v8 = vrot.slane %v2057_v2, 1  ;;  %s2000_s5 = smov 2   ;;  %v90_v11 = vrot.slane %v2052_v1, 3  ;;  %v92_v12 = vrot.slane %v2057_v2, 3  ;;  %v2085_v16 = vld [vmem:[%s2486_s0 + $0x20] sm:$0xff] }
  0x15   :  { %v68_v9 = vsel %vm65_vm0, %v66_v3, %v67_v4  ;;  %v45_v10 = vsel %vm42_vm1, %v43_v5, %v44_v6  ;;  %vm88_vm2 = vcmask 1044480   ;;  %v89_v15 = vrot.slane %v2047_v0, 3  ;;  %v2090_v17 = vld [vmem:[%s2486_s0 + $0x28] sm:$0xff]  ;;  %s2001_s10 = smov 6   ;;  %v2112_v29 = vld [vmem:[%s2486_s0 + $0x30] sm:$0xff]  ;;  %s2002_s13 = smov 10  }
  0x16   :  { %76 = vrot.lane.b32.xlu1 %v68_v9, %s1999_s1  ;;  %53 = vrot.lane.b32.xlu0 %v45_v10, %s2000_s5  ;;  %v2074_v13 = vsel %vm65_vm0, %v67_v4, %v69_v7  ;;  %v2079_v14 = vsel %vm42_vm1, %v44_v6, %v46_v8  ;;  %v93_v18 = vsel %vm88_vm2, %v90_v11, %v92_v12  ;;  %v48_v19 = vrot.slane %v2085_v16, 1  ;;  %s2003_s14 = smov 12   ;;  %s2004_s15 = smov 14   ;;  %v299_v3 = vld [vmem:[#allocation2] sm:$0xff]  ;;  %v300_v4 = vld [vmem:[#allocation2 + $0x8] sm:$0xff] }
  0x17   :  { %v91_v20 = vsel %vm88_vm2, %v89_v15, %v90_v11  ;;  %v49_v21 = vrot.slane %v2090_v17, 1  ;;  %v112_v22 = vrot.slane %v2047_v0, 4  ;;  %v113_v23 = vrot.slane %v2052_v1, 4  ;;  %s2005_s16 = smov 16   ;;  %v31_v11 = vld [vmem:[%s2486_s0 + $0x18] sm:$0x3] }
  0x18   :  { %vm111_vm3 = vcmask 1043456   ;;  %v135_v24 = vrot.slane %v2047_v0, 5  ;;  %v136_v27 = vrot.slane %v2052_v1, 5  ;;  %v115_v28 = vrot.slane %v2057_v2, 4  ;;  %v301_v12 = vld [vmem:[#allocation2 + $0x10] sm:$0x3f] }
  0x19   :  { %v50_v25 = vsel %vm42_vm1, %v48_v19, %v49_v21  ;;  %v114_v26 = vsel %vm111_vm3, %v112_v22, %v113_v23  ;;  %vm134_vm4 = vcmask 1042432   ;;  %v71_v30 = vrot.slane %v2085_v16, 2  ;;  %s2006_s19 = smov 18   ;;  %s2007_s20 = smov 20  }
  0x1a   :  { %78 = vrot.lane.b32.xlu1 %v2074_v13, %s1999_s1  ;;  %55 = vrot.lane.b32.xlu0 %v2079_v14, %s2000_s5  ;;  %v137_v31 = vsel %vm134_vm4, %v135_v24, %v136_v27  ;;  %v116_v32 = vsel %vm111_vm3, %v113_v23, %v115_v28  ;;  %v72_v33 = vrot.slane %v2090_v17, 2  ;;  %v51_v34 = vrot.slane %v2112_v29, 1  ;;  %s2010_s7 = smov 64  }
  0x1b   :  { %v158_v35 = vrot.slane %v2047_v0, 6  ;;  %v159_v38 = vrot.slane %v2052_v1, 6  ;;  %v138_v39 = vrot.slane %v2057_v2, 5  ;;  %vm157_vm5 = vcmask 1041408  }
  0x1c   :  { %v73_v36 = vsel %vm65_vm0, %v71_v30, %v72_v33  ;;  %v2128_v37 = vsel %vm42_vm1, %v49_v21, %v51_v34  ;;  %v94_v40 = vrot.slane %v2085_v16, 3  ;;  %v95_v43 = vrot.slane %v2090_v17, 3 }
  0x1d   :  { %v160_v41 = vsel %vm157_vm5, %v158_v35, %v159_v38  ;;  %v139_v42 = vsel %vm134_vm4, %v136_v27, %v138_v39  ;;  %v74_v44 = vrot.slane %v2112_v29, 2  ;;  %v181_v45 = vrot.slane %v2047_v0, 7 }
  0x1e   :  { %101 = vrot.lane.b32.xlu1 %v93_v18, %s2001_s10  ;;  %99 = vrot.lane.b32.xlu0 %v91_v20, %s2001_s10  ;;  %v96_v46 = vsel %vm88_vm2, %v94_v40, %v95_v43  ;;  %v182_v48 = vrot.slane %v2052_v1, 7  ;;  %v161_v49 = vrot.slane %v2057_v2, 6  ;;  %vm2490_vm6 = vcmask 1040384  }
  0x1f   :  { %v2147_v47 = vsel %vm65_vm0, %v72_v33, %v74_v44  ;;  %v117_v50 = vrot.slane %v2085_v16, 4  ;;  %v118_v53 = vrot.slane %v2090_v17, 4  ;;  %v97_v54 = vrot.slane %v2112_v29, 3 }
  0x20   :  { %v183_v51 = vsel %vm2490_vm6, %v181_v45, %v182_v48  ;;  %v162_v52 = vsel %vm157_vm5, %v159_v38, %v161_v49  ;;  %v184_v57 = vrot.slane %v2057_v2, 7  ;;  %v140_v59 = vrot.slane %v2085_v16, 5 }
  0x21   :  { %v119_v55 = vsel %vm111_vm3, %v117_v50, %v118_v53  ;;  %v98_v56 = vsel %vm88_vm2, %v95_v43, %v97_v54  ;;  %v141_v60 = vrot.slane %v2090_v17, 5  ;;  %v120_v61 = vrot.slane %v2112_v29, 4 }
  0x22   :  { %57 = vrot.lane.b32.xlu1 %v50_v25, %s2000_s5  ;;  %122 = vrot.lane.b32.xlu0 %v114_v26, %s1998_s23  ;;  %v185_v58 = vsel %vm2490_vm6, %v182_v48, %v184_v57  ;;  %v1796_v5 = vpack.c.bf16 %v300_v4, %v299_v3  ;;  %v163_v6 = vrot.slane %v2085_v16, 6  ;;  %v164_v9 = vrot.slane %v2090_v17, 6 }
  0x23   :  { %v142_v62 = vsel %vm134_vm4, %v140_v59, %v141_v60  ;;  %v121_v63 = vsel %vm111_vm3, %v118_v53, %v120_v61  ;;  %v143_v10 = vrot.slane %v2112_v29, 5  ;;  %v217_v19 = vrot.slane %v31_v11, 1 }
  0x24   :  { %1797 = vmatprep.subr.bf16.mxu1 %v1796_v5  ;;  %v165_v15 = vsel %vm157_vm5, %v163_v6, %v164_v9  ;;  %v186_v20 = vrot.slane %v2085_v16, 7  ;;  %v187_v21 = vrot.slane %v2090_v17, 7  ;;  %v166_v22 = vrot.slane %v2112_v29, 6 }
  0x25   :  { %1799 = vmatpush3.bf16.msra.mxu1 %v1796_v5  ;;  %v144_v18 = vsel %vm134_vm4, %v141_v60, %v143_v10  ;;  %v189_v25 = vrot.slane %v2112_v29, 7  ;;  %v233_v26 = vrot.slane %v31_v11, 2  ;;  %vm249_vm7 = vcmask 15360  }
  0x26   :  { %145 = vrot.lane.b32.xlu1 %v137_v31, %s2002_s13  ;;  %124 = vrot.lane.b32.xlu0 %v116_v32, %s1998_s23  ;;  %v188_v23 = vsel %vm2490_vm6, %v186_v20, %v187_v21  ;;  %v167_v24 = vsel %vm157_vm5, %v164_v9, %v166_v22  ;;  %vm254_vm8 = vcmask 31744   ;;  %vm259_vm9 = vcmask 48128  }
  0x27   :  { %1728 = vmatprep.subr.msk.mxu1 %vm65_vm0, %v301_v12  ;;  %v234_v27 = vsel %vm65_vm0, %v69_v7, %v233_v26  ;;  %vm264_vm10 = vcmask 64512   ;;  %vm269_vm11 = vcmask 80896   ;;  %vm274_vm12 = vcmask 97280  }
  0x28   :  { %vm279_vm13 = vcmask 113664   ;;  %vm284_vm14 = vcmask 130048   ;;  %vm289_vm15 = vcmask 146432   ;;  %vm294_vm4 = vcmask 162816  }
  0x29   :  { %1729 = vmatpush3.msk.msra.mxu1 %vm65_vm0, %v301_v12 }
  0x2a   :  { %80 = vrot.lane.b32.xlu1 %v73_v36, %s1999_s1  ;;  %59 = vrot.lane.b32.xlu0 %v2128_v37, %s2000_s5 }
  0x2e   :  { %168 = vrot.lane.b32.xlu1 %v160_v41, %s2003_s14  ;;  %147 = vrot.lane.b32.xlu0 %v139_v42, %s2002_s13 }
  0x32   :  { %103 = vrot.lane.b32.xlu1 %v96_v46, %s2001_s10  ;;  %82 = vrot.lane.b32.xlu0 %v2147_v47, %s1999_s1 }
  0x36   :  { %191 = vrot.lane.b32.xlu1 %v183_v51, %s2004_s15  ;;  %170 = vrot.lane.b32.xlu0 %v162_v52, %s2003_s14 }
  0x3a   :  { %126 = vrot.lane.b32.xlu1 %v119_v55, %s1998_s23  ;;  %105 = vrot.lane.b32.xlu0 %v98_v56, %s2001_s10 }
  0x3e   :  { %203 = vrot.lane.b32.xlu1 %v2052_v1, %s2005_s16  ;;  %193 = vrot.lane.b32.xlu0 %v185_v58, %s2004_s15 }
  0x42   :  { %149 = vrot.lane.b32.xlu1 %v142_v62, %s2002_s13  ;;  %128 = vrot.lane.b32.xlu0 %v121_v63, %s1998_s23 }
  0x46   :  { %221 = vrot.lane.b32.xlu1 %v2079_v14, %s2006_s19  ;;  %205 = vrot.lane.b32.xlu0 %v2057_v2, %s2005_s16  ;;  %v218_v14 = vsel %vm42_vm1, %v46_v8, %v217_v19  ;;  %v190_v8 = vsel %vm2490_vm6, %v187_v21, %v189_v25  ;;  %vm307_vm6 = vcmask 179200  }
  0x4a   :  { %172 = vrot.lane.b32.xlu1 %v165_v15, %s2003_s14  ;;  %151 = vrot.lane.b32.xlu0 %v144_v18, %s2002_s13 }
  0x4e   :  { %237 = vrot.lane.b32.xlu1 %v2074_v13, %s2007_s20  ;;  %223 = vrot.lane.b32.xlu0 %v218_v14, %s2006_s19  ;;  %v35_v13 = vld [vmem:[%s2486_s0 + $0x38] sm:$0x3]  ;;  %s2008_s0 = smov 118  }
  0x4f   :  { %v219_v28 = vrot.slane %v35_v13, 1  ;;  %v235_v30 = vrot.slane %v35_v13, 2 }
  0x51   :  { %v220_v2 = vsel %vm42_vm1, %v51_v34, %v219_v28  ;;  %v236_v7 = vsel %vm65_vm0, %v74_v44, %v235_v30 }
  0x52   :  { %195 = vrot.lane.b32.xlu1 %v188_v23, %s2004_s15  ;;  %174 = vrot.lane.b32.xlu0 %v167_v24, %s2003_s14 }
  0x56   :  { %197 = vrot.lane.b32.xlu1 %v190_v8, %s2004_s15  ;;  %239 = vrot.lane.b32.xlu0 %v234_v27, %s2007_s20 }
  0x5a   :  { %209 = vrot.lane.b32.xlu1 %v2112_v29, %s2005_s16  ;;  %207 = vrot.lane.b32.xlu0 %v2090_v17, %s2005_s16 }
  0x5e   :  { %227 = vrot.lane.b32.xlu1 %v220_v2, %s2006_s19  ;;  %225 = vrot.lane.b32.xlu0 %v2128_v37, %s2006_s19 }
  0x62   :  { %243 = vrot.lane.b32.xlu1 %v236_v7, %s2007_s20  ;;  %241 = vrot.lane.b32.xlu0 %v2147_v47, %s2007_s20 }
  0x88   :  { %v77_v31 = vpop.permute.xlu1 %76  ;;  %v54_v32 = vpop.permute.xlu0 %53 }
  0x89   :  { %v250_v54 = vsel %vm249_vm7, %v2047_v0, %v54_v32 }
  0x8a   :  { %v255_v57 = vsel %vm254_vm8, %v250_v54, %v77_v31  ;;  %v577_v54 = vld [vmem:[#allocation2 + $0x118] sm:$0xff] }
  0x8c   :  { %v79_v33 = vpop.permute.xlu1 %78  ;;  %v56_v35 = vpop.permute.xlu0 %55 }
  0x8d   :  { %v251_v63 = vsel %vm249_vm7, %v2052_v1, %v56_v35 }
  0x8e   :  { %v256_v10 = vsel %vm254_vm8, %v251_v63, %v79_v33 }
  0x90   :  { %v102_v36 = vpop.permute.xlu1 %101  ;;  %v100_v38 = vpop.permute.xlu0 %99 }
  0x91   :  { %v260_v58 = vsel %vm259_vm9, %v255_v57, %v100_v38  ;;  %v261_v12 = vsel %vm259_vm9, %v256_v10, %v102_v36  ;;  %v565_v10 = vld [vmem:[#allocation2 + $0xb8] sm:$0xff] }
  0x94   :  { %v2228_v34 = vpop.permute.xlu1 %57  ;;  %v123_v39 = vpop.permute.xlu0 %122 }
  0x95   :  { %v265_v59 = vsel %vm264_vm10, %v260_v58, %v123_v39  ;;  %v252_v26 = vsel %vm249_vm7, %v2085_v16, %v2228_v34  ;;  %v563_v58 = vld [vmem:[#allocation2 + $0xa8] sm:$0xff] }
  0x98   :  { %v146_v40 = vpop.permute.xlu1 %145  ;;  %v125_v41 = vpop.permute.xlu0 %124 }
  0x99   :  { %v270_v60 = vsel %vm269_vm11, %v265_v59, %v146_v40  ;;  %v266_v1 = vsel %vm264_vm10, %v261_v12, %v125_v41  ;;  %v564_v59 = vld [vmem:[#allocation2 + $0xb0] sm:$0xff] }
  0x9c   :  { %v2230_v42 = vpop.permute.xlu1 %80  ;;  %v60_v37 = vpop.permute.xlu0 %59 }
  0x9d   :  { %v253_v8 = vsel %vm249_vm7, %v2090_v17, %v60_v37  ;;  %v257_v28 = vsel %vm254_vm8, %v252_v26, %v2230_v42  ;;  %v568_v26 = vld [vmem:[#allocation2 + $0xd0] sm:$0xff] }
  0xa0   :  { %v169_v29 = vpop.permute.xlu1 %168  ;;  %v148_v43 = vpop.permute.xlu0 %147 }
  0xa1   :  { %v275_v0 = vsel %vm274_vm12, %v270_v60, %v169_v29  ;;  %v271_v15 = vsel %vm269_vm11, %v266_v1, %v148_v43  ;;  %v1804_v60 = vpack.c.bf16 %v564_v59, %v563_v58  ;;  %v549_v1 = vld [vmem:[#allocation2 + $0x38] sm:$0xff]  ;;  %v574_v58 = vld [vmem:[#allocation2 + $0x100] sm:$0xff] }
  0xa4   :  { %v104_v44 = vpop.permute.xlu1 %103  ;;  %v83_v45 = vpop.permute.xlu0 %82 }
  0xa5   :  { %v258_v2 = vsel %vm254_vm8, %v253_v8, %v83_v45  ;;  %v262_v30 = vsel %vm259_vm9, %v257_v28, %v104_v44  ;;  %v599_v28 = vld [vmem:[#allocation2 + $0x1c8] sm:$0xff] }
  0xa8   :  { %v192_v46 = vpop.permute.xlu1 %191  ;;  %v171_v47 = vpop.permute.xlu0 %170 }
  0xa9   :  { %v280_v3 = vsel %vm279_vm13, %v275_v0, %v192_v46  ;;  %v276_v14 = vsel %vm274_vm12, %v271_v15, %v171_v47  ;;  %v561_v46 = vld [vmem:[#allocation2 + $0x98] sm:$0xff]  ;;  %v562_v47 = vld [vmem:[#allocation2 + $0xa0] sm:$0xff]  ;;  %v595_v0 = vld [vmem:[#allocation2 + $0x1a8] sm:$0xff] }
  0xaa   :  { %v550_v15 = vld [vmem:[#allocation2 + $0x40] sm:$0xff] }
  0xac   :  { %v127_v48 = vpop.permute.xlu1 %126  ;;  %v106_v49 = vpop.permute.xlu0 %105 }
  0xad   :  { %v263_v7 = vsel %vm259_vm9, %v258_v2, %v106_v49  ;;  %v267_v31 = vsel %vm264_vm10, %v262_v30, %v127_v48  ;;  %v1800_v48 = vpack.c.bf16 %v562_v47, %v561_v46  ;;  %v545_v49 = vld [vmem:[#allocation2 + $0x18] sm:$0xff]  ;;  %v600_v30 = vld [vmem:[#allocation2 + $0x1d0] sm:$0xff] }
  0xae   :  { %v572_v46 = vld [vmem:[#allocation2 + $0xf0] sm:$0xff] }
  0xaf   :  { %1801 = vmatprep.subr.bf16.mxu1 %v1800_v48  ;;  %v555_v48 = vld [vmem:[#allocation2 + $0x68] sm:$0xff] }
  0xb0   :  { %v204_v50 = vpop.permute.xlu1 %203  ;;  %v194_v51 = vpop.permute.xlu0 %193 }
  0xb1   :  { %v285_v4 = vsel %vm284_vm14, %v280_v3, %v204_v50  ;;  %v281_v20 = vsel %vm279_vm13, %v276_v14, %v194_v51  ;;  %v546_v50 = vld [vmem:[#allocation2 + $0x20] sm:$0xff]  ;;  %v593_v51 = vld [vmem:[#allocation2 + $0x198] sm:$0xff]  ;;  %v596_v3 = vld [vmem:[#allocation2 + $0x1b0] sm:$0xff] }
  0xb2   :  { %v598_v14 = vld [vmem:[#allocation2 + $0x1c0] sm:$0xff] }
  0xb4   :  { %v150_v52 = vpop.permute.xlu1 %149  ;;  %v129_v53 = vpop.permute.xlu0 %128 }
  0xb5   :  { %v268_v32 = vsel %vm264_vm10, %v263_v7, %v129_v53  ;;  %v272_v16 = vsel %vm269_vm11, %v267_v31, %v150_v52  ;;  %v1802_v52 = vpack.c.bf16 %v546_v50, %v545_v49  ;;  %v594_v53 = vld [vmem:[#allocation2 + $0x1a0] sm:$0xff]  ;;  %v583_v7 = vld [vmem:[#allocation2 + $0x148] sm:$0xff]  ;;  %v584_v31 = vld [vmem:[#allocation2 + $0x150] sm:$0xff] }
  0xb6   :  { %v556_v49 = vld [vmem:[#allocation2 + $0x70] sm:$0xff]  ;;  %v603_v50 = vld [vmem:[#allocation2 + $0x1e8] sm:$0xff] }
  0xb8   :  { %v222_v55 = vpop.permute.xlu1 %221  ;;  %v206_v56 = vpop.permute.xlu0 %205 }
  0xb9   :  { %v290_v5 = vsel %vm289_vm15, %v285_v4, %v222_v55  ;;  %v286_v21 = vsel %vm284_vm14, %v281_v20, %v206_v56  ;;  %v578_v55 = vld [vmem:[#allocation2 + $0x120] sm:$0xff]  ;;  %v1832_v56 = vpack.c.bf16 %v594_v53, %v593_v51  ;;  %v579_v4 = vld [vmem:[#allocation2 + $0x128] sm:$0xff]  ;;  %v581_v20 = vld [vmem:[#allocation2 + $0x138] sm:$0xff]  ;;  %v1822_v51 = vpack.c.bf16 %v556_v49, %v555_v48 }
  0xba   :  { %v1834_v57 = vpack.c.bf16 %v578_v55, %v577_v54  ;;  %v587_v53 = vld [vmem:[#allocation2 + $0x168] sm:$0xff]  ;;  %v588_v54 = vld [vmem:[#allocation2 + $0x170] sm:$0xff] }
  0xbb   :  { %1833 = vmatprep.subr.bf16.mxu0 %v1832_v56  ;;  %v1854_v56 = vpack.c.bf16 %v588_v54, %v587_v53 }
  0xbc   :  { %v173_v61 = vpop.permute.xlu1 %172  ;;  %v152_v62 = vpop.permute.xlu0 %151  ;;  %1835 = vmatpush3.bf16.msra.mxu0 %v1834_v57  ;;  %v573_v57 = vld [vmem:[#allocation2 + $0xf8] sm:$0xff] }
  0xbd   :  { %v273_v33 = vsel %vm269_vm11, %v268_v32, %v152_v62  ;;  %v277_v36 = vsel %vm274_vm12, %v272_v16, %v173_v61  ;;  %v547_v61 = vld [vmem:[#allocation2 + $0x28] sm:$0xff]  ;;  %v548_v62 = vld [vmem:[#allocation2 + $0x30] sm:$0xff]  ;;  %v1844_v32 = vpack.c.bf16 %v600_v30, %v599_v28  ;;  %v1846_v16 = vpack.c.bf16 %v584_v31, %v583_v7 }
  0xbe   :  { %v1806_v63 = vpack.c.bf16 %v548_v62, %v547_v61  ;;  %v1824_v59 = vpack.c.bf16 %v574_v58, %v573_v57  ;;  %v558_v61 = vld [vmem:[#allocation2 + $0x80] sm:$0xff]  ;;  %v605_v62 = vld [vmem:[#allocation2 + $0x1f8] sm:$0xff] }
  0xc0   :  { %v238_v6 = vpop.permute.xlu1 %237  ;;  %v224_v9 = vpop.permute.xlu0 %223 }
  0xc1   :  { %v295_v11 = vsel %vm294_vm4, %v290_v5, %v238_v6  ;;  %v291_v22 = vsel %vm289_vm15, %v286_v21, %v224_v9  ;;  %v580_v5 = vld [vmem:[#allocation2 + $0x130] sm:$0xff]  ;;  %v1836_v6 = vpack.c.bf16 %v596_v3, %v595_v0  ;;  %v582_v21 = vld [vmem:[#allocation2 + $0x140] sm:$0xff]  ;;  %v589_v3 = vld [vmem:[#allocation2 + $0x178] sm:$0xff] }
  0xc2   :  { %1199 = vrot.lane.b32.xlu1 %v295_v11, %s2008_s0  ;;  %1730 = vmatprep.mubr.msk.f32.mxu1 %vm307_vm6, %v295_v11  ;;  %v1838_v9 = vpack.c.bf16 %v580_v5, %v579_v4  ;;  %v566_v11 = vld [vmem:[#allocation2 + $0xc0] sm:$0xff] }
  0xc3   :  { %1837 = vmatprep.subr.bf16.mxu0 %v1836_v6  ;;  %v1808_v12 = vpack.c.bf16 %v566_v11, %v565_v10  ;;  %v590_v4 = vld [vmem:[#allocation2 + $0x180] sm:$0xff]  ;;  %v576_v10 = vld [vmem:[#allocation2 + $0x110] sm:$0xff] }
  0xc4   :  { %v196_v18 = vpop.permute.xlu1 %195  ;;  %v175_v19 = vpop.permute.xlu0 %174  ;;  %1839 = vmatpush3.bf16.msra.mxu0 %v1838_v9  ;;  %v1858_v6 = vpack.c.bf16 %v590_v4, %v589_v3  ;;  %v575_v9 = vld [vmem:[#allocation2 + $0x108] sm:$0xff] }
  0xc5   :  { %v278_v38 = vsel %vm274_vm12, %v273_v33, %v175_v19  ;;  %v282_v34 = vsel %vm279_vm13, %v277_v36, %v196_v18  ;;  %v597_v18 = vld [vmem:[#allocation2 + $0x1b8] sm:$0xff]  ;;  %v1810_v19 = vpack.c.bf16 %v550_v15, %v549_v1  ;;  %v1828_v11 = vpack.c.bf16 %v576_v10, %v575_v9  ;;  %v560_v1 = vld [vmem:[#allocation2 + $0x90] sm:$0xff]  ;;  %v607_v15 = vld [vmem:[#allocation2 + $0x208] sm:$0xff] }
  0xc6   :  { %v569_v33 = vld [vmem:[#allocation2 + $0xd8] sm:$0xff] }
  0xc7   :  { %v553_v36 = vld [vmem:[#allocation2 + $0x58] sm:$0xff] }
  0xc8   :  { %v198_v23 = vpop.permute.xlu1 %197  ;;  %v240_v24 = vpop.permute.xlu0 %239 }
  0xc9   :  { %v2256_v25 = vsel %vm294_vm4, %v291_v22, %v240_v24  ;;  %v283_v39 = vsel %vm279_vm13, %v278_v38, %v198_v23  ;;  %v1840_v22 = vpack.c.bf16 %v598_v14, %v597_v18  ;;  %v1842_v23 = vpack.c.bf16 %v582_v21, %v581_v20  ;;  %v567_v24 = vld [vmem:[#allocation2 + $0xc8] sm:$0xff]  ;;  %v554_v38 = vld [vmem:[#allocation2 + $0x60] sm:$0xff]  ;;  %v592_v20 = vld [vmem:[#allocation2 + $0x190] sm:$0xff] }
  0xca   :  { %1731 = vmatmul.mubr.msk.f32.vlgmr.msra.gmra.mrb[0].mxu1 %vm307_vm6, %v2256_v25  ;;  %v1812_v8 = vpack.c.bf16 %v568_v26, %v567_v24  ;;  %v591_v14 = vld [vmem:[#allocation2 + $0x188] sm:$0xff]  ;;  %v610_v24 = vld [vmem:[#allocation2 + $0x220] sm:$0xff] }
  0xcb   :  { %1803 = vmatpush3.bf16.msra.mxu1 %v1802_v52  ;;  %1841 = vmatprep.subr.bf16.mxu0 %v1840_v22  ;;  %v604_v52 = vld [vmem:[#allocation2 + $0x1f0] sm:$0xff]  ;;  %v1862_v22 = vpack.c.bf16 %v592_v20, %v591_v14 }
  0xcc   :  { %v210_v27 = vpop.permute.xlu1 %209  ;;  %v208_v13 = vpop.permute.xlu0 %207  ;;  %1805 = vmatprep.subr.bf16.mxu1 %v1804_v60  ;;  %1843 = vmatpush3.bf16.msra.mxu0 %v1842_v23  ;;  %v1852_v55 = vpack.c.bf16 %v604_v52, %v603_v50  ;;  %v557_v60 = vld [vmem:[#allocation2 + $0x78] sm:$0xff]  ;;  %v612_v14 = vld [vmem:[#allocation2 + $0x230] sm:$0xff] }
  0xcd   :  { %v288_v40 = vsel %vm284_vm14, %v283_v39, %v210_v27  ;;  %v287_v41 = vsel %vm284_vm14, %v282_v34, %v208_v13  ;;  %v551_v27 = vld [vmem:[#allocation2 + $0x48] sm:$0xff]  ;;  %v552_v13 = vld [vmem:[#allocation2 + $0x50] sm:$0xff]  ;;  %1845 = vmatprep.subr.bf16.mxu0 %v1844_v32  ;;  %v601_v34 = vld [vmem:[#allocation2 + $0x1d8] sm:$0xff]  ;;  %v1818_v39 = vpack.c.bf16 %v554_v38, %v553_v36  ;;  %v1826_v0 = vpack.c.bf16 %v558_v61, %v557_v60 }
  0xce   :  { %v1814_v2 = vpack.c.bf16 %v552_v13, %v551_v27  ;;  %v609_v23 = vld [vmem:[#allocation2 + $0x218] sm:$0xff] }
  0xcf   :  { %1807 = vmatpush3.bf16.msra.mxu1 %v1806_v63  ;;  %v606_v63 = vld [vmem:[#allocation2 + $0x200] sm:$0xff]  ;;  %v2292_v26 = vpack.c.bf16 %v610_v24, %v609_v23  ;;  %v613_v24 = vld [vmem:[#allocation2 + $0x238] sm:$0xff] }
  0xd0   :  { %v228_v17 = vpop.permute.xlu1 %227  ;;  %v226_v35 = vpop.permute.xlu0 %225  ;;  %1809 = vmatprep.subr.bf16.mxu1 %v1808_v12  ;;  %1847 = vmatpush3.bf16.msra.mxu0 %v1846_v16  ;;  %v1856_v5 = vpack.c.bf16 %v606_v63, %v605_v62  ;;  %v559_v12 = vld [vmem:[#allocation2 + $0x88] sm:$0xff]  ;;  %v1565_v62 = vld [vmem:[%s2488_s2 + $0x1] ss:$0 sm:$0xff] }
  0xd1   :  { %v293_v42 = vsel %vm289_vm15, %v288_v40, %v228_v17  ;;  %v292_v37 = vsel %vm289_vm15, %v287_v41, %v226_v35  ;;  %v570_v17 = vld [vmem:[#allocation2 + $0xe0] sm:$0xff]  ;;  %v585_v41 = vld [vmem:[#allocation2 + $0x158] sm:$0xff]  ;;  %v1830_v18 = vpack.c.bf16 %v560_v1, %v559_v12 }
  0xd2   :  { %v1816_v35 = vpack.c.bf16 %v570_v17, %v569_v33  ;;  %v602_v40 = vld [vmem:[#allocation2 + $0x1e0] sm:$0xff] }
  0xd3   :  { %1811 = vmatpush3.bf16.msra.mxu1 %v1810_v19  ;;  %v608_v19 = vld [vmem:[#allocation2 + $0x210] sm:$0xff] }
  0xd4   :  { %v244_v29 = vpop.permute.xlu1 %243  ;;  %v242_v43 = vpop.permute.xlu0 %241  ;;  %1813 = vmatprep.subr.bf16.mxu1 %v1812_v8  ;;  %v1860_v21 = vpack.c.bf16 %v608_v19, %v607_v15  ;;  %v1559_v8 = vld [vmem:[%s2488_s2] ss:$0 sm:$0xff]  ;;  %v611_v19 = vld [vmem:[#allocation2 + $0x228] sm:$0xff] }
  0xd5   :  { %v2283_v44 = vsel %vm294_vm4, %v293_v42, %v244_v29  ;;  %v2286_v45 = vsel %vm294_vm4, %v292_v37, %v242_v43  ;;  %v586_v42 = vld [vmem:[#allocation2 + $0x160] sm:$0xff]  ;;  %v1848_v37 = vpack.c.bf16 %v602_v40, %v601_v34  ;;  %v571_v43 = vld [vmem:[#allocation2 + $0xe8] sm:$0xff] }
  0xd6   :  { %1733 = vmatprep.mubr.msk.f32.mxu1 %vm307_vm6, %v2286_v45  ;;  %v1850_v29 = vpack.c.bf16 %v586_v42, %v585_v41  ;;  %v1820_v47 = vpack.c.bf16 %v572_v46, %v571_v43 }
  0xd7   :  { %1734 = vmatmul.mubr.msk.f32.gmra.mrb[2].mxu1 %vm307_vm6, %v2283_v44  ;;  %1849 = vmatprep.subr.bf16.mxu0 %v1848_v37  ;;  %vm2316_vm6 = vmneg %vm157_vm5 }
  0xd8   :  { %1815 = vmatpush3.bf16.msra.mxu1 %v1814_v2  ;;  %1851 = vmatpush3.bf16.msra.mxu0 %v1850_v29 }
  0xd9   :  { %1817 = vmatprep.subr.bf16.mxu1 %v1816_v35  ;;  %1853 = vmatprep.subr.bf16.mxu0 %v1852_v55 }
  0xdc   :  { %1819 = vmatpush3.bf16.msra.mxu1 %v1818_v39  ;;  %1855 = vmatpush3.bf16.msra.mxu0 %v1854_v56 }
  0xdd   :  { %1821 = vmatprep.subr.bf16.mxu1 %v1820_v47  ;;  %1857 = vmatprep.subr.bf16.mxu0 %v1856_v5  ;;  %v1566_v5 = vld [vmem:[%s2488_s2 + $0x2] ss:$0 sm:$0xff] }
  0xe0   :  { %1823 = vmatpush3.bf16.msra.mxu1 %v1822_v51  ;;  %1859 = vmatpush3.bf16.msra.mxu0 %v1858_v6 }
  0xe1   :  { %1825 = vmatprep.subr.bf16.mxu1 %v1824_v59  ;;  %1861 = vmatprep.subr.bf16.mxu0 %v1860_v21 }
  0xe4   :  { %1827 = vmatpush3.bf16.msra.mxu1 %v1826_v0  ;;  %1863 = vmatpush3.bf16.msra.mxu0 %v1862_v22 }
  0xe5   :  { %1829 = vmatprep.subr.bf16.mxu1 %v1828_v11 }
  0xe8   :  { %1831 = vmatpush3.bf16.msra.mxu1 %v1830_v18 }
  0xe9   :  { %1865 = vmatprep.subr.bf16.mxu1 %v2292_v26 }
 0x19d   :  { %v1732_v27 = vpop.f32.mrb[0].mxu1 }
 0x19e   :  { %v395_v13 = vadd.f32 %v1732_v27, %v1559_v8  ;;  %v389_v28 = vpop.f32.mrb[1].mxu1 }
 0x19f   :  { %v390_v2 = vadd.f32 %v1559_v8, %v389_v28 }
 0x1a1   :  { %v410_v30 = vadd.f32 %v395_v13, %v390_v2 }
 0x1aa   :  { %v1735_v7 = vpop.f32.mrb[2].mxu1 }
 0x1ab   :  { %v399_v31 = vpop.f32.mrb[3].mxu1  ;;  %v405_v16 = vadd.f32 %v1735_v7, %v1559_v8 }
 0x1ac   :  { %v400_v32 = vadd.f32 %v1559_v8, %v399_v31  ;;  %v614_v8 = vld [vmem:[#allocation2 + $0x240] sm:$0xff] }
 0x1ad   :  { %v2306_v7 = vpack.c.bf16 %v614_v8, %v613_v24  ;;  %v619_v24 = vld [vmem:[#allocation2 + $0x268] sm:$0xff]  ;;  %v620_v8 = vld [vmem:[#allocation2 + $0x270] sm:$0xff] }
 0x1ae   :  { %v411_v33 = vadd.f32 %v410_v30, %v400_v32  ;;  %v1868_v30 = vpack.c.bf16 %v612_v14, %v611_v19 }
 0x1b0   :  { %v412_v17 = vadd.f32 %v411_v33, %v405_v16 }
 0x1b2   :  { %v413_v35 = vrot.slane %v412_v17, 4 }
 0x1b4   :  { %v414_v36 = vadd.f32 %v413_v35, %v412_v17 }
 0x1b6   :  { %v415_v38 = vrot.slane %v414_v36, 2 }
 0x1b8   :  { %v416_v34 = vadd.f32 %v415_v38, %v414_v36 }
 0x1ba   :  { %v417_v39 = vrot.slane %v416_v34, 1 }
 0x1bc   :  { %v418_v40 = vadd.f32 %v417_v39, %v416_v34 }
 0x1be   :  { %v420_v41 = vmul.f32 0.03125, %v418_v40 }
 0x1c0   :  { %v421_v42 = vsub.f32 %v390_v2, %v420_v41  ;;  %v422_v37 = vsub.f32 %v395_v13, %v420_v41  ;;  %v423_v29 = vsub.f32 %v400_v32, %v420_v41  ;;  %v424_v43 = vsub.f32 %v405_v16, %v420_v41 }
 0x1c2   :  { %v425_v46 = vmul.f32 %v421_v42, %v421_v42  ;;  %v426_v47 = vmul.f32 %v422_v37, %v422_v37  ;;  %v427_v48 = vmul.f32 %v423_v29, %v423_v29  ;;  %v428_v50 = vmul.f32 %v424_v43, %v424_v43 }
 0x1c4   :  { %v429_v49 = vadd.f32 %v426_v47, %v425_v46 }
 0x1c6   :  { %v430_v51 = vadd.f32 %v429_v49, %v427_v48 }
 0x1c8   :  { %v431_v52 = vadd.f32 %v430_v51, %v428_v50 }
 0x1ca   :  { %v432_v53 = vrot.slane %v431_v52, 4 }
 0x1cc   :  { %v433_v54 = vadd.f32 %v432_v53, %v431_v52 }
 0x1ce   :  { %v434_v55 = vrot.slane %v433_v54, 2 }
 0x1d0   :  { %v435_v56 = vadd.f32 %v434_v55, %v433_v54 }
 0x1d2   :  { %v436_v57 = vrot.slane %v435_v56, 1 }
 0x1d4   :  { %v437_v58 = vadd.f32 %v436_v57, %v435_v56 }
 0x1d6   :  { %v438_v59 = vmul.f32 0.03125, %v437_v58 }
 0x1d8   :  { %v439_v60 = vadd.f32 1e-05, %v438_v59 }
 0x1da   :  { %1960 = vrsqrt.f32 %v439_v60 }
 0x1e4   :  { %v1961_v61 = vpop.eup %1960 }
 0x1e5   :  { %v441_v0 = vmul.f32 %v1961_v61, %v421_v42  ;;  %v442_v63 = vmul.f32 %v1961_v61, %v422_v37  ;;  %v443_v3 = vmul.f32 %v1961_v61, %v423_v29  ;;  %v444_v4 = vmul.f32 %v1961_v61, %v424_v43 }
 0x1e7   :  { %v449_v6 = vmul.f32 %v1565_v62, %v441_v0  ;;  %v450_v9 = vmul.f32 %v1565_v62, %v442_v63  ;;  %v451_v10 = vmul.f32 %v1565_v62, %v443_v3  ;;  %v452_v11 = vmul.f32 %v1565_v62, %v444_v4  ;;  %v615_v63 = vld [vmem:[#allocation2 + $0x248] sm:$0xff]  ;;  %v616_v3 = vld [vmem:[#allocation2 + $0x250] sm:$0xff] }
 0x1e8   :  { %v1876_v19 = vpack.c.bf16 %v616_v3, %v615_v63 }
 0x1e9   :  { %v458_v12 = vadd.f32 %v1566_v5, %v450_v9  ;;  %v459_v1 = vadd.f32 %v1566_v5, %v451_v10  ;;  %v460_v15 = vadd.f32 %v1566_v5, %v452_v11  ;;  %v457_v18 = vadd.f32 %v1566_v5, %v449_v6 }
 0x1eb   :  { %v462_v20 = vmax.f32 %v458_v12, 0.0  ;;  %v463_v21 = vmax.f32 %v459_v1, 0.0  ;;  %v464_v22 = vmax.f32 %v460_v15, 0.0  ;;  %v461_v23 = vmax.f32 %v457_v18, 0.0 }
 0x1ed   :  { %v2304_v27 = vrot.slane %v463_v21, 6  ;;  %v469_v13 = vrot.slane %v461_v23, 6  ;;  %v470_v28 = vrot.slane %v462_v20, 6  ;;  %v473_v2 = vrot.slane %v464_v22, 6  ;;  %v617_v20 = vld [vmem:[#allocation2 + $0x258] sm:$0xff]  ;;  %v618_v21 = vld [vmem:[#allocation2 + $0x260] sm:$0xff] }
 0x1ee   :  { %v1880_v23 = vpack.c.bf16 %v618_v21, %v617_v20  ;;  %v1020_v20 = vld [vmem:[#allocation2 + $0x2e8] sm:$0xff]  ;;  %v1021_v21 = vld [vmem:[#allocation2 + $0x2f0] sm:$0xff] }
 0x1ef   :  { %v471_v31 = vsel %vm157_vm5, %v469_v13, %v470_v28  ;;  %v481_v32 = vsel %vm157_vm5, 0.0, %v469_v13  ;;  %v483_v16 = vsel %vm157_vm5, %v470_v28, 0.0  ;;  %v2313_v33 = vsel %vm157_vm5, %v2304_v27, %v473_v2  ;;  %v621_v28 = vld [vmem:[#allocation2 + $0x278] sm:$0xff] }
 0x1f0   :  { %v489_v17 = vrot.slane %v481_v32, 1  ;;  %v490_v35 = vrot.slane %v471_v31, 1  ;;  %v517_v36 = vrot.slane %v481_v32, 3  ;;  %v518_v38 = vrot.slane %v471_v31, 3 }
 0x1f1   :  { %v503_v39 = vrot.slane %v481_v32, 2  ;;  %v504_v40 = vrot.slane %v471_v31, 2  ;;  %v492_v41 = vrot.slane %v483_v16, 1  ;;  %v520_v42 = vrot.slane %v483_v16, 3 }
 0x1f2   :  { %v491_v37 = vsel %vm42_vm1, %v489_v17, %v490_v35  ;;  %v519_v29 = vsel %vm88_vm2, %v517_v36, %v518_v38  ;;  %v506_v43 = vrot.slane %v483_v16, 2  ;;  %v482_v46 = vsel %vm157_vm5, 0.0, %v2304_v27  ;;  %v1012_v17 = vld [vmem:[#allocation2 + $0x2a8] sm:$0xff] }
 0x1f3   :  { %694 = vmatprep.mubr.f32.mxu1 %v491_v37  ;;  %779 = vmatprep.mubr.f32.mxu0 %v519_v29  ;;  %v505_v47 = vsel %vm65_vm0, %v503_v39, %v504_v40  ;;  %v493_v48 = vsel %vm42_vm1, %v490_v35, %v492_v41  ;;  %v521_v49 = vsel %vm88_vm2, %v518_v38, %v520_v42  ;;  %v494_v50 = vrot.slane %v482_v46, 1  ;;  %v1013_v39 = vld [vmem:[#allocation2 + $0x2b0] sm:$0xff] }
 0x1f4   :  { %1569 = vmatmul.mubr.msk.f32.vlgmr.msra.gmra.mrb[4].mxu1 %vm2316_vm6, %v469_v13  ;;  %780 = vmatmul.mubr.f32.vlgmr.msra.gmra.mrb[0].mxu0 %v505_v47  ;;  %v507_v51 = vsel %vm65_vm0, %v504_v40, %v506_v43  ;;  %v495_v52 = vrot.slane %v2313_v33, 1  ;;  %v522_v53 = vrot.slane %v482_v46, 3  ;;  %v523_v54 = vrot.slane %v2313_v33, 3  ;;  %v1567_v40 = vld [vmem:[%s2488_s2 + $0x3] ss:$0 sm:$0xff] }
 0x1f5   :  { %1867 = vmatpush3.bf16.msra.mxu1 %v2292_v26  ;;  %699 = vmatprep.mubr.f32.mxu1 %v493_v48  ;;  %v508_v55 = vrot.slane %v482_v46, 2  ;;  %v509_v56 = vrot.slane %v2313_v33, 2  ;;  %v484_v57 = vsel %vm157_vm5, %v473_v2, 0.0  ;;  %v531_v58 = vrot.slane %v481_v32, 4  ;;  %v622_v2 = vld [vmem:[#allocation2 + $0x280] sm:$0xff]  ;;  %v1200_v32 = vpop.permute.xlu1 %1199 }
 0x1f6   :  { %784 = vmatprep.mubr.f32.mxu0 %v521_v49  ;;  %1869 = vmatprep.subr.bf16.mxu1 %v1868_v30  ;;  %v496_v59 = vsel %vm42_vm1, %v494_v50, %v495_v52  ;;  %v524_v60 = vsel %vm88_vm2, %v522_v53, %v523_v54  ;;  %v497_v61 = vrot.slane %v484_v57, 1  ;;  %v525_v62 = vrot.slane %v484_v57, 3  ;;  %v1015_v47 = vld [vmem:[#allocation2 + $0x2c0] sm:$0xff] }
 0x1f7   :  { %v510_v0 = vsel %vm65_vm0, %v508_v55, %v509_v56  ;;  %v511_v26 = vrot.slane %v484_v57, 2  ;;  %v532_v4 = vrot.slane %v471_v31, 4  ;;  %v534_v5 = vrot.slane %v483_v16, 4  ;;  %v1010_v16 = vld [vmem:[#allocation2 + $0x298] sm:$0xff] }
 0x1f8   :  { %700 = vmatmul.mubr.f32.gmra.mrb[6].mxu1 %v471_v31  ;;  %785 = vmatmul.mubr.f32.gmra.mrb[2].mxu0 %v507_v51  ;;  %v498_v6 = vsel %vm42_vm1, %v495_v52, %v497_v61  ;;  %v526_v9 = vsel %vm88_vm2, %v523_v54, %v525_v62  ;;  %v536_v10 = vrot.slane %v482_v46, 4  ;;  %v537_v11 = vrot.slane %v2313_v33, 4  ;;  %v1014_v46 = vld [vmem:[#allocation2 + $0x2b8] sm:$0xff] }
 0x1f9   :  { %1871 = vmatpush3.bf16.msra.mxu1 %v1868_v30  ;;  %704 = vmatprep.mubr.f32.mxu1 %v496_v59  ;;  %v512_v12 = vsel %vm65_vm0, %v509_v56, %v511_v26  ;;  %v533_v1 = vsel %vm111_vm3, %v531_v58, %v532_v4  ;;  %v535_v15 = vsel %vm111_vm3, %v532_v4, %v534_v5  ;;  %v539_v18 = vrot.slane %v484_v57, 4  ;;  %v623_v30 = vld [vmem:[#allocation2 + $0x288] sm:$0xff]  ;;  %v1017_v58 = vld [vmem:[#allocation2 + $0x2d0] sm:$0xff]  ;;  %v1018_v5 = vld [vmem:[#allocation2 + $0x2d8] sm:$0xff] }
 0x1fa   :  { %789 = vmatprep.mubr.f32.mxu0 %v524_v60  ;;  %1873 = vmatprep.subr.bf16.mxu1 %v2306_v7  ;;  %v538_v14 = vsel %vm111_vm3, %v536_v10, %v537_v11  ;;  %v1884_v13 = vpack.c.bf16 %v620_v8, %v619_v24  ;;  %v2009_v38 = vmov 0.0|0.0   ;;  %v1900_v43 = vpack.c.bf16 %v1013_v39, %v1012_v17  ;;  %v1016_v57 = vld [vmem:[#allocation2 + $0x2c8] sm:$0xff]  ;;  %v1022_v8 = vld [vmem:[#allocation2 + $0x2f8] sm:$0xff] }
 0x1fb   :  { %v540_v22 = vsel %vm111_vm3, %v537_v11, %v539_v18  ;;  %1896 = vmatprep.subr.bf16.mxu0 %v2009_v38  ;;  %v1903_v56 = vpack.c.bf16 %v1015_v47, %v1014_v46  ;;  %v1906_v4 = vpack.c.bf16 %v1017_v58, %v1016_v57  ;;  %v1912_v24 = vpack.c.bf16 %v1021_v21, %v1020_v20 }
 0x1fc   :  { %1571 = vmatmul.mubr.msk.f32.gmra.mrb[8].mxu1 %vm2316_vm6, %v2304_v27  ;;  %790 = vmatmul.mubr.f32.gmra.mrb[4].mxu0 %v510_v0  ;;  %v1888_v27 = vpack.c.bf16 %v622_v2, %v621_v28  ;;  %v1024_v2 = vld [vmem:[#allocation2 + $0x308] sm:$0xff]  ;;  %vm887_vm2 = vcmask 523264   ;;  %vm2493_vm3 = vcmask 1040384  }
 0x1fd   :  { %1875 = vmatpush3.bf16.msra.mxu1 %v2306_v7  ;;  %709 = vmatprep.mubr.f32.mxu1 %v498_v6  ;;  %v624_v7 = vld [vmem:[#allocation2 + $0x290] sm:$0xff]  ;;  %v1019_v6 = vld [vmem:[#allocation2 + $0x2e0] sm:$0xff]  ;;  %vm2494_vm8 = vmmov %vm2493_vm3 }
 0x1fe   :  { %794 = vmatprep.mubr.f32.mxu0 %v526_v9  ;;  %1877 = vmatprep.subr.bf16.mxu1 %v1876_v19  ;;  %v1892_v31 = vpack.c.bf16 %v624_v7, %v623_v30  ;;  %v1026_v7 = vld [vmem:[#allocation2 + $0x318] sm:$0xff]  ;;  %vm2496_vm10 = vmmov %vm2493_vm3 }
 0x1ff   :  { %vm2497_vm11 = vmmov %vm2493_vm3 }
 0x200   :  { %710 = vmatmul.mubr.f32.gmra.mrb[10].mxu1 %v2313_v33  ;;  %795 = vmatmul.mubr.f32.gmra.mrb[6].mxu0 %v512_v12  ;;  %v1011_v33 = vld [vmem:[#allocation2 + $0x2a0] sm:$0xff]  ;;  %vm2498_vm12 = vmmov %vm2493_vm3 }
 0x201   :  { %1879 = vmatpush3.bf16.msra.mxu1 %v1876_v19  ;;  %1768 = vmatprep.mubr.f32.mxu1 %v533_v1  ;;  %v1897_v34 = vpack.c.bf16 %v1011_v33, %v1010_v16  ;;  %v1028_v16 = vld [vmem:[#allocation2 + $0x328] sm:$0xff]  ;;  %v1029_v33 = vld [vmem:[#allocation2 + $0x330] sm:$0xff] }
 0x202   :  { %1881 = vmatprep.subr.bf16.mxu1 %v1880_v23  ;;  %v1924_v39 = vpack.c.bf16 %v1029_v33, %v1028_v16 }
 0x203   :  { %1898 = vmatpush1.bf16.msra.mxu0 %v1897_v34 }
 0x204   :  { %1899 = vmatprep.subr.bf16.mxu0 %v2009_v38 }
 0x205   :  { %1883 = vmatpush3.bf16.msra.mxu1 %v1880_v23 }
 0x206   :  { %1885 = vmatprep.subr.bf16.mxu1 %v1884_v13 }
 0x207   :  { %1901 = vmatpush1.bf16.msra.mxu0 %v1900_v43 }
 0x208   :  { %1902 = vmatprep.subr.bf16.mxu0 %v2009_v38 }
 0x209   :  { %1887 = vmatpush3.bf16.msra.mxu1 %v1884_v13  ;;  %v1023_v13 = vld [vmem:[#allocation2 + $0x300] sm:$0xff] }
 0x20a   :  { %1889 = vmatprep.subr.bf16.mxu1 %v1888_v27  ;;  %v1915_v28 = vpack.c.bf16 %v1023_v13, %v1022_v8  ;;  %v1572_v8 = vld [vmem:[%s2488_s2 + $0x4] ss:$0 sm:$0xff] }
 0x20b   :  { %1904 = vmatpush1.bf16.msra.mxu0 %v1903_v56 }
 0x20c   :  { %1905 = vmatprep.subr.bf16.mxu0 %v2009_v38 }
 0x20d   :  { %1891 = vmatpush3.bf16.msra.mxu1 %v1888_v27  ;;  %v1025_v27 = vld [vmem:[#allocation2 + $0x310] sm:$0xff] }
 0x20e   :  { %1893 = vmatprep.subr.bf16.mxu1 %v1892_v31  ;;  %v1918_v30 = vpack.c.bf16 %v1025_v27, %v1024_v2 }
 0x20f   :  { %1907 = vmatpush1.bf16.msra.mxu0 %v1906_v4 }
 0x210   :  { %1908 = vmatprep.subr.bf16.mxu0 %v2009_v38 }
 0x211   :  { %1895 = vmatpush3.bf16.msra.mxu1 %v1892_v31  ;;  %v1027_v31 = vld [vmem:[#allocation2 + $0x320] sm:$0xff] }
 0x214   :  { %1769 = vmatmul.mubr.f32.vlgmr.msra.gmra.mrb[12].mxu1 %v535_v15 }
 0x215   :  { %1771 = vmatprep.mubr.f32.mxu1 %v538_v14  ;;  %v1909_v14 = vpack.c.bf16 %v1019_v6, %v1018_v5 }
 0x217   :  { %1910 = vmatpush1.bf16.msra.mxu0 %v1909_v14 }
 0x218   :  { %1772 = vmatmul.mubr.f32.gmra.mrb[14].mxu1 %v540_v22  ;;  %1911 = vmatprep.subr.bf16.mxu0 %v2009_v38 }
 0x219   :  { %1776 = vmatprep.mubr.msk.f32.mxu1 %vm249_vm7, %v1200_v32  ;;  %v1921_v32 = vpack.c.bf16 %v1027_v31, %v1026_v7  ;;  %v1573_v7 = vld [vmem:[%s2488_s2 + $0x5] ss:$0 sm:$0xff] }
 0x21b   :  { %1913 = vmatpush1.bf16.msra.mxu0 %v1912_v24 }
 0x21c   :  { %1914 = vmatprep.subr.bf16.mxu0 %v2009_v38 }
 0x21f   :  { %1916 = vmatpush1.bf16.msra.mxu0 %v1915_v28 }
 0x220   :  { %1917 = vmatprep.subr.bf16.mxu0 %v2009_v38 }
 0x223   :  { %1919 = vmatpush1.bf16.msra.mxu0 %v1918_v30  ;;  %v1193_v30 = vld [vmem:[#allocation2 + $0x358] sm:$0x3] }
 0x224   :  { %1920 = vmatprep.subr.bf16.mxu0 %v2009_v38  ;;  %1774 = vmatprep.subr.msk.mxu1 %vm157_vm5, %v1193_v30 }
 0x225   :  { %1775 = vmatpush3.msk.msra.mxu1 %vm157_vm5, %v1193_v30  ;;  %vm2495_vm5 = vmmov %vm2493_vm3  ;;  %v1374_v30 = vld [vmem:[#allocation2 + $0x378] sm:$0xff] }
 0x227   :  { %1922 = vmatpush1.bf16.msra.mxu0 %v1921_v32 }
 0x228   :  { %1923 = vmatprep.subr.bf16.mxu0 %v2009_v38 }
 0x22b   :  { %1925 = vmatpush1.bf16.msra.mxu0 %v1924_v39  ;;  %v1032_v39 = vld [vmem:[#allocation2 + $0x348] sm:$0xff] }
 0x22c   :  { %1926 = vmatprep.subr.bf16.mxu0 %v2009_v38 }
 0x2c7   :  { %v1635_v35 = vpop.f32.mrb[4].mxu1  ;;  %v1679_v36 = vpop.f32.mrb[0].mxu0 }
 0x2c8   :  { %v1636_v41 = vpop.f32.mrb[5].mxu1  ;;  %v1680_v42 = vpop.f32.mrb[1].mxu0 }
 0x2c9   :  { %v1637_v37 = vadd.f32 %v1636_v41, %v1635_v35  ;;  %v1681_v29 = vadd.f32 %v1680_v42, %v1679_v36  ;;  %v1030_v41 = vld [vmem:[#allocation2 + $0x338] sm:$0xff]  ;;  %v1031_v42 = vld [vmem:[#allocation2 + $0x340] sm:$0xff] }
 0x2cb   :  { %v697_v48 = vadd.f32 %v1637_v37, %v1567_v40  ;;  %v1638_v49 = vpop.f32.mrb[6].mxu1  ;;  %v1682_v50 = vpop.f32.mrb[2].mxu0 }
 0x2cc   :  { %v1639_v51 = vpop.f32.mrb[7].mxu1  ;;  %v1683_v52 = vpop.f32.mrb[3].mxu0 }
 0x2cd   :  { %v1640_v53 = vadd.f32 %v1639_v51, %v1638_v49  ;;  %v1684_v54 = vadd.f32 %v1683_v52, %v1682_v50  ;;  %v782_v55 = vadd.f32 %v1681_v29, %v697_v48  ;;  %v1927_v49 = vpack.c.bf16 %v1031_v42, %v1030_v41 }
 0x2cf   :  { %v702_v59 = vadd.f32 %v1640_v53, %v1567_v40  ;;  %v1641_v60 = vpop.f32.mrb[8].mxu1  ;;  %v1685_v61 = vpop.f32.mrb[4].mxu0  ;;  %1928 = vmatpush1.bf16.msra.mxu0 %v1927_v49 }
 0x2d0   :  { %v1642_v62 = vpop.f32.mrb[9].mxu1  ;;  %v1686_v0 = vpop.f32.mrb[5].mxu0  ;;  %1929 = vmatprep.subr.bf16.mxu0 %v2009_v38 }
 0x2d1   :  { %v1643_v63 = vadd.f32 %v1642_v62, %v1641_v60  ;;  %v1687_v3 = vadd.f32 %v1686_v0, %v1685_v61  ;;  %v787_v26 = vadd.f32 %v1684_v54, %v702_v59 }
 0x2d3   :  { %v707_v9 = vadd.f32 %v1643_v63, %v1567_v40  ;;  %v1644_v10 = vpop.f32.mrb[10].mxu1  ;;  %v1688_v11 = vpop.f32.mrb[6].mxu0 }
 0x2d4   :  { %v1645_v12 = vpop.f32.mrb[11].mxu1  ;;  %v1689_v1 = vpop.f32.mrb[7].mxu0 }
 0x2d5   :  { %v1646_v15 = vadd.f32 %v1645_v12, %v1644_v10  ;;  %v1690_v18 = vadd.f32 %v1689_v1, %v1688_v11  ;;  %v792_v19 = vadd.f32 %v1687_v3, %v707_v9 }
 0x2d7   :  { %v712_v22 = vadd.f32 %v1646_v15, %v1567_v40 }
 0x2d9   :  { %v797_v23 = vadd.f32 %v1690_v18, %v712_v22 }
 0x2e7   :  { %v1770_v17 = vpop.f32.mrb[12].mxu1 }
 0x2e8   :  { %v872_v35 = vadd.f32 %v1770_v17, %v787_v26  ;;  %v866_v36 = vpop.f32.mrb[13].mxu1 }
 0x2e9   :  { %v867_v34 = vadd.f32 %v866_v36, %v782_v55 }
 0x2ea   :  { %v889_v40 = vsel %vm887_vm2, %v872_v35, 0.0 }
 0x2eb   :  { %v888_v37 = vsel %vm887_vm2, %v867_v34, 0.0  ;;  %v1773_v29 = vpop.f32.mrb[14].mxu1 }
 0x2ec   :  { %v890_v43 = vadd.f32 %v889_v40, %v888_v37  ;;  %v882_v46 = vadd.f32 %v1773_v29, %v797_v23  ;;  %v876_v47 = vpop.f32.mrb[15].mxu1  ;;  %v1033_v40 = vld [vmem:[#allocation2 + $0x350] sm:$0xff] }
 0x2ed   :  { %v877_v48 = vadd.f32 %v876_v47, %v792_v19 }
 0x2ee   :  { %v893_v52 = vsel %vm887_vm2, %v882_v46, 0.0 }
 0x2ef   :  { %v891_v50 = vsel %vm887_vm2, %v877_v48, 0.0 }
 0x2f0   :  { %v892_v51 = vadd.f32 %v891_v50, %v890_v43  ;;  %v1930_v43 = vpack.c.bf16 %v1033_v40, %v1032_v39 }
 0x2f2   :  { %v894_v53 = vadd.f32 %v893_v52, %v892_v51  ;;  %1931 = vmatpush1.bf16.msra.mxu0 %v1930_v43 }
 0x2f4   :  { %v895_v54 = vrot.slane %v894_v53, 4 }
 0x2f6   :  { %v896_v55 = vadd.f32 %v895_v54, %v894_v53 }
 0x2f8   :  { %v897_v56 = vrot.slane %v896_v55, 2 }
 0x2fa   :  { %v898_v57 = vadd.f32 %v897_v56, %v896_v55 }
 0x2fc   :  { %v899_v58 = vrot.slane %v898_v57, 1 }
 0x2fe   :  { %v900_v59 = vadd.f32 %v899_v58, %v898_v57 }
 0x300   :  { %v901_v60 = vmul.f32 0.03125, %v900_v59 }
 0x302   :  { %v902_v61 = vsub.f32 %v867_v34, %v901_v60  ;;  %v903_v62 = vsub.f32 %v872_v35, %v901_v60  ;;  %v904_v0 = vsub.f32 %v877_v48, %v901_v60  ;;  %v905_v63 = vsub.f32 %v882_v46, %v901_v60 }
 0x304   :  { %v906_v3 = vmul.f32 %v902_v61, %v902_v61  ;;  %v907_v26 = vmul.f32 %v903_v62, %v903_v62  ;;  %v908_v4 = vmul.f32 %v904_v0, %v904_v0  ;;  %v909_v5 = vmul.f32 %v905_v63, %v905_v63 }
 0x306   :  { %v910_v6 = vsel %vm887_vm2, %v906_v3, 0.0  ;;  %v911_v9 = vsel %vm887_vm2, %v907_v26, 0.0  ;;  %v913_v10 = vsel %vm887_vm2, %v908_v4, 0.0  ;;  %v915_v12 = vsel %vm887_vm2, %v909_v5, 0.0 }
 0x307   :  { %v912_v38 = vadd.f32 %v911_v9, %v910_v6 }
 0x309   :  { %v914_v11 = vadd.f32 %v913_v10, %v912_v38 }
 0x30b   :  { %v916_v1 = vadd.f32 %v915_v12, %v914_v11 }
 0x30d   :  { %v917_v15 = vrot.slane %v916_v1, 4 }
 0x30f   :  { %v918_v18 = vadd.f32 %v917_v15, %v916_v1 }
 0x311   :  { %v919_v19 = vrot.slane %v918_v18, 2 }
 0x313   :  { %v920_v14 = vadd.f32 %v919_v19, %v918_v18 }
 0x315   :  { %v921_v20 = vrot.slane %v920_v14, 1 }
 0x317   :  { %v922_v21 = vadd.f32 %v921_v20, %v920_v14 }
 0x319   :  { %v923_v22 = vmul.f32 0.03125, %v922_v21 }
 0x31b   :  { %v924_v23 = vadd.f32 1e-05, %v923_v22 }
 0x31d   :  { %1962 = vrsqrt.f32 %v924_v23 }
 0x327   :  { %v1963_v24 = vpop.eup %1962 }
 0x328   :  { %v926_v13 = vmul.f32 %v1963_v24, %v902_v61  ;;  %v927_v28 = vmul.f32 %v1963_v24, %v903_v62  ;;  %v928_v2 = vmul.f32 %v1963_v24, %v904_v0  ;;  %v929_v27 = vmul.f32 %v1963_v24, %v905_v63 }
 0x32a   :  { %v934_v31 = vmul.f32 %v1572_v8, %v926_v13  ;;  %v935_v32 = vmul.f32 %v1572_v8, %v927_v28  ;;  %v936_v16 = vmul.f32 %v1572_v8, %v928_v2  ;;  %v937_v33 = vmul.f32 %v1572_v8, %v929_v27  ;;  %v1371_v13 = vld [vmem:[#allocation2 + $0x360] sm:$0xff]  ;;  %v1372_v28 = vld [vmem:[#allocation2 + $0x368] sm:$0xff]  ;;  %v1373_v2 = vld [vmem:[#allocation2 + $0x370] sm:$0xff] }
 0x32b   :  { %v1932_v27 = vpack.c.bf16 %v1372_v28, %v1371_v13 }
 0x32c   :  { %v944_v17 = vadd.f32 %v1573_v7, %v936_v16  ;;  %v945_v35 = vadd.f32 %v1573_v7, %v937_v33  ;;  %v942_v36 = vadd.f32 %v1573_v7, %v934_v31  ;;  %v943_v34 = vadd.f32 %v1573_v7, %v935_v32  ;;  %v1581_v31 = vld [vmem:[%s2488_s2 + $0x9] ss:$0 sm:$0xff]  ;;  %v1574_v32 = vld [vmem:[%s2488_s2 + $0x6] ss:$0 sm:$0xff] }
 0x32d   :  { %v1936_v7 = vpack.c.bf16 %v1374_v30, %v1373_v2  ;;  %1933 = vmatprep.subr.bf16.mxu1 %v1932_v27 }
 0x32e   :  { %v948_v41 = vmax.f32 %v944_v17, 0.0  ;;  %v949_v42 = vmax.f32 %v945_v35, 0.0  ;;  %v946_v37 = vmax.f32 %v942_v36, 0.0  ;;  %v947_v29 = vmax.f32 %v943_v34, 0.0 }
 0x330   :  { %v957_v46 = vrot.slane %v948_v41, 7  ;;  %v958_v47 = vrot.slane %v949_v42, 7  ;;  %v954_v48 = vrot.slane %v946_v37, 7  ;;  %v955_v49 = vrot.slane %v947_v29, 7 }
 0x332   :  { %v959_v50 = vsel %vm2493_vm3, %v957_v46, %v958_v47  ;;  %v967_v51 = vsel %vm2494_vm8, 0.0, %v957_v46  ;;  %v956_v52 = vsel %vm2495_vm5, %v954_v48, %v955_v49  ;;  %v966_v53 = vsel %vm2496_vm10, 0.0, %v954_v48 }
 0x333   :  { %v979_v54 = vrot.slane %v967_v51, 1  ;;  %v980_v55 = vrot.slane %v959_v50, 1  ;;  %v996_v56 = vrot.slane %v966_v53, 2  ;;  %v997_v57 = vrot.slane %v956_v52, 2 }
 0x334   :  { %v968_v58 = vsel %vm2497_vm11, %v955_v49, 0.0  ;;  %v974_v59 = vrot.slane %v966_v53, 1  ;;  %v975_v60 = vrot.slane %v956_v52, 1  ;;  %v969_v6 = vsel %vm2498_vm12, %v958_v47, 0.0 }
 0x335   :  { %v981_v61 = vsel %vm42_vm1, %v979_v54, %v980_v55  ;;  %v998_v62 = vsel %vm65_vm0, %v996_v56, %v997_v57  ;;  %v977_v0 = vrot.slane %v968_v58, 1  ;;  %v999_v3 = vrot.slane %v968_v58, 2 }
 0x336   :  { %988 = vrot.lane.b32.xlu1 %v981_v61, %s2010_s7  ;;  %1575 = vmatprep.mubr.msk.f32.mxu0 %vm887_vm2, %v998_v62  ;;  %v976_v63 = vsel %vm42_vm1, %v974_v59, %v975_v60  ;;  %v982_v9 = vrot.slane %v969_v6, 1  ;;  %v1002_v19 = vrot.slane %v959_v50, 2  ;;  %v1004_v20 = vrot.slane %v969_v6, 2 }
 0x337   :  { %v978_v26 = vsel %vm42_vm1, %v975_v60, %v977_v0  ;;  %v1000_v5 = vsel %vm65_vm0, %v997_v57, %v999_v3 }
 0x338   :  { %v1955_v4 = vpack.i.bf16 %v978_v26, %v976_v63  ;;  %v983_v38 = vsel %vm42_vm1, %v980_v55, %v982_v9  ;;  %v1005_v24 = vsel %vm65_vm0, %v1002_v19, %v1004_v20 }
 0x33a   :  { %1956 = vrot.lane.b32.xlu0 %v1955_v4, %s2010_s7  ;;  %1205 = vrot.lane.b32.xlu1 %v2283_v44, %s2008_s0  ;;  %v1001_v44 = vrot.slane %v967_v51, 2 }
 0x33c   :  { %v1003_v14 = vsel %vm65_vm0, %v1001_v44, %v1002_v19  ;;  %vm1134_vm0 = vcmask 261120  }
 0x33e   :  { %1201 = vrot.lane.b32.xlu0 %v2256_v25, %s2008_s0 }
 0x342   :  { %1203 = vrot.lane.b32.xlu0 %v2286_v45, %s2008_s0 }
 0x346   :  { %990 = vrot.lane.b32.xlu0 %v983_v38, %s2010_s7 }
 0x3a8   :  { %v989_v12 = vpop.permute.xlu1 %988 }
 0x3a9   :  { %v1008_v22 = vsel %vm887_vm2, %v967_v51, %v989_v12 }
 0x3ac   :  { %v1957_v10 = vpop.permute.xlu0 %1956  ;;  %v1206_v21 = vpop.permute.xlu1 %1205 }
 0x3ad   :  { %v1958_v11 = vunpack.i.l.bf16 %v1957_v10  ;;  %v1959_v1 = vunpack.i.h.bf16 %v1957_v10 }
 0x3af   :  { %v1006_v15 = vsel %vm887_vm2, %v966_v53, %v1958_v11  ;;  %v1007_v25 = vsel %vm887_vm2, %v956_v52, %v1959_v1 }
 0x3b0   :  { %v1202_v18 = vpop.permute.xlu0 %1201  ;;  %1112 = vmatmul.mubr.f32.vlgmr.msra.gmra.mrb[8].mxu0 %v1006_v15 }
 0x3b1   :  { %1576 = vmatprep.mubr.msk.f32.mxu0 %vm887_vm2, %v1000_v5  ;;  %1777 = vmatmul.mubr.msk.f32.vlgmr.msra.gmra.mrb[16].mxu1 %vm249_vm7, %v1202_v18 }
 0x3b2   :  { %1935 = vmatpush3.bf16.msra.mxu1 %v1932_v27 }
 0x3b3   :  { %1937 = vmatprep.subr.bf16.mxu1 %v1936_v7 }
 0x3b4   :  { %v1204_v45 = vpop.permute.xlu0 %1203  ;;  %1117 = vmatmul.mubr.f32.gmra.mrb[10].mxu0 %v1007_v25 }
 0x3b5   :  { %1577 = vmatprep.mubr.msk.f32.mxu0 %vm887_vm2, %v1003_v14  ;;  %1779 = vmatprep.mubr.msk.f32.mxu1 %vm249_vm7, %v1204_v45 }
 0x3b6   :  { %1780 = vmatmul.mubr.msk.f32.gmra.mrb[18].mxu1 %vm249_vm7, %v1206_v21 }
 0x3b7   :  { %1939 = vmatpush3.bf16.msra.mxu1 %v1936_v7 }
 0x3b8   :  { %v991_v23 = vpop.permute.xlu0 %990  ;;  %1122 = vmatmul.mubr.f32.gmra.mrb[12].mxu0 %v1008_v22 }
 0x3b9   :  { %1578 = vmatprep.mubr.msk.f32.mxu0 %vm887_vm2, %v1005_v24  ;;  %v1009_v8 = vsel %vm887_vm2, %v959_v50, %v991_v23 }
 0x3bc   :  { %1127 = vmatmul.mubr.f32.gmra.mrb[14].mxu0 %v1009_v8 }
 0x483   :  { %v1113_v16 = vpop.f32.mrb[8].mxu0 }
 0x484   :  { %v1115_v33 = vpop.f32.mrb[9].mxu0  ;;  %v1778_v17 = vpop.f32.mrb[16].mxu1  ;;  %v1114_v34 = vadd.f32 %v1574_v32, %v1113_v16 }
 0x485   :  { %v1290_v35 = vadd.f32 %v1778_v17, %v1581_v31  ;;  %v1284_v36 = vpop.f32.mrb[17].mxu1 }
 0x486   :  { %v1285_v39 = vadd.f32 %v1581_v31, %v1284_v36  ;;  %v1135_v47 = vsel %vm1134_vm0, %v1114_v34, 0.0 }
 0x487   :  { %v1306_v40 = vsel %vm1134_vm0, %v1290_v35, 0.0  ;;  %v1118_v41 = vpop.f32.mrb[10].mxu0 }
 0x488   :  { %v1305_v42 = vsel %vm1134_vm0, %v1285_v39, 0.0  ;;  %v1119_v37 = vadd.f32 %v1574_v32, %v1118_v41  ;;  %v1120_v29 = vpop.f32.mrb[11].mxu0 }
 0x489   :  { %v1307_v43 = vadd.f32 %v1306_v40, %v1305_v42  ;;  %v1781_v46 = vpop.f32.mrb[18].mxu1 }
 0x48a   :  { %v1136_v48 = vsel %vm1134_vm0, %v1119_v37, 0.0  ;;  %v1294_v49 = vpop.f32.mrb[19].mxu1  ;;  %v1300_v51 = vadd.f32 %v1781_v46, %v1581_v31 }
 0x48b   :  { %v1137_v50 = vadd.f32 %v1136_v48, %v1135_v47  ;;  %v1295_v52 = vadd.f32 %v1581_v31, %v1294_v49  ;;  %v1123_v53 = vpop.f32.mrb[12].mxu0 }
 0x48c   :  { %v1124_v54 = vadd.f32 %v1574_v32, %v1123_v53  ;;  %v1125_v55 = vpop.f32.mrb[13].mxu0  ;;  %v1310_v59 = vsel %vm1134_vm0, %v1300_v51, 0.0 }
 0x48d   :  { %v1308_v56 = vsel %vm1134_vm0, %v1295_v52, 0.0 }
 0x48e   :  { %v1309_v57 = vadd.f32 %v1308_v56, %v1307_v43  ;;  %v1138_v58 = vsel %vm1134_vm0, %v1124_v54, 0.0 }
 0x48f   :  { %v1139_v60 = vadd.f32 %v1138_v58, %v1137_v50  ;;  %v1128_v61 = vpop.f32.mrb[14].mxu0 }
 0x490   :  { %v1311_v62 = vadd.f32 %v1310_v59, %v1309_v57  ;;  %v1129_v0 = vadd.f32 %v1574_v32, %v1128_v61  ;;  %v1130_v63 = vpop.f32.mrb[15].mxu0 }
 0x491   :  { %v1587_v63 = vld [vmem:[%s2488_s2 + $0xa] ss:$0 sm:$0xff] }
 0x492   :  { %v1312_v3 = vrot.slane %v1311_v62, 4  ;;  %v1140_v26 = vsel %vm1134_vm0, %v1129_v0, 0.0 }
 0x493   :  { %v1141_v4 = vadd.f32 %v1140_v26, %v1139_v60 }
 0x494   :  { %v1313_v5 = vadd.f32 %v1312_v3, %v1311_v62 }
 0x495   :  { %v1142_v6 = vrot.slane %v1141_v4, 4 }
 0x496   :  { %v1314_v9 = vrot.slane %v1313_v5, 2 }
 0x497   :  { %v1143_v38 = vadd.f32 %v1142_v6, %v1141_v4 }
 0x498   :  { %v1315_v10 = vadd.f32 %v1314_v9, %v1313_v5 }
 0x499   :  { %v1144_v11 = vrot.slane %v1143_v38, 2 }
 0x49a   :  { %v1316_v12 = vrot.slane %v1315_v10, 1 }
 0x49b   :  { %v1145_v1 = vadd.f32 %v1144_v11, %v1143_v38 }
 0x49c   :  { %v1317_v15 = vadd.f32 %v1316_v12, %v1315_v10  ;;  %v1579_v10 = vld [vmem:[%s2488_s2 + $0x7] ss:$0 sm:$0xff] }
 0x49d   :  { %v1146_v18 = vrot.slane %v1145_v1, 1 }
 0x49e   :  { %v1318_v44 = vmul.f32 0.03125, %v1317_v15 }
 0x49f   :  { %v1147_v19 = vadd.f32 %v1146_v18, %v1145_v1  ;;  %v1588_v1 = vld [vmem:[%s2488_s2 + $0xb] ss:$0 sm:$0xff] }
 0x4a0   :  { %v1319_v25 = vsub.f32 %v1285_v39, %v1318_v44  ;;  %v1320_v45 = vsub.f32 %v1290_v35, %v1318_v44  ;;  %v1321_v14 = vsub.f32 %v1295_v52, %v1318_v44  ;;  %v1322_v20 = vsub.f32 %v1300_v51, %v1318_v44 }
 0x4a1   :  { %v1148_v21 = vmul.f32 0.03125, %v1147_v19 }
 0x4a2   :  { %v1323_v22 = vmul.f32 %v1319_v25, %v1319_v25  ;;  %v1324_v23 = vmul.f32 %v1320_v45, %v1320_v45  ;;  %v1325_v24 = vmul.f32 %v1321_v14, %v1321_v14  ;;  %v1326_v27 = vmul.f32 %v1322_v20, %v1322_v20 }
 0x4a3   :  { %v1149_v8 = vsub.f32 %v1114_v34, %v1148_v21  ;;  %v1150_v13 = vsub.f32 %v1119_v37, %v1148_v21  ;;  %v1151_v28 = vsub.f32 %v1124_v54, %v1148_v21  ;;  %v1152_v2 = vsub.f32 %v1129_v0, %v1148_v21 }
 0x4a4   :  { %v1327_v30 = vsel %vm1134_vm0, %v1323_v22, 0.0  ;;  %v1328_v7 = vsel %vm1134_vm0, %v1324_v23, 0.0  ;;  %v1330_v17 = vsel %vm1134_vm0, %v1325_v24, 0.0  ;;  %v1332_v40 = vsel %vm1134_vm0, %v1326_v27, 0.0 }
 0x4a5   :  { %v1329_v31 = vadd.f32 %v1328_v7, %v1327_v30  ;;  %v1153_v32 = vmul.f32 %v1149_v8, %v1149_v8  ;;  %v1154_v16 = vmul.f32 %v1150_v13, %v1150_v13  ;;  %v1155_v33 = vmul.f32 %v1151_v28, %v1151_v28 }
 0x4a6   :  { %v1156_v36 = vmul.f32 %v1152_v2, %v1152_v2 }
 0x4a7   :  { %v1331_v35 = vadd.f32 %v1330_v17, %v1329_v31  ;;  %v1157_v39 = vsel %vm1134_vm0, %v1153_v32, 0.0  ;;  %v1158_v34 = vsel %vm1134_vm0, %v1154_v16, 0.0  ;;  %v1160_v37 = vsel %vm1134_vm0, %v1155_v33, 0.0 }
 0x4a8   :  { %v1159_v41 = vadd.f32 %v1158_v34, %v1157_v39  ;;  %v1162_v46 = vsel %vm1134_vm0, %v1156_v36, 0.0  ;;  %v1589_v39 = vld [vmem:[%s2488_s2 + $0xc] ss:$0 sm:$0xff] }
 0x4a9   :  { %v1333_v42 = vadd.f32 %v1332_v40, %v1331_v35 }
 0x4aa   :  { %v1161_v29 = vadd.f32 %v1160_v37, %v1159_v41 }
 0x4ab   :  { %v1334_v43 = vrot.slane %v1333_v42, 4 }
 0x4ac   :  { %v1163_v47 = vadd.f32 %v1162_v46, %v1161_v29 }
 0x4ad   :  { %v1335_v48 = vadd.f32 %v1334_v43, %v1333_v42 }
 0x4ae   :  { %v1164_v49 = vrot.slane %v1163_v47, 4 }
 0x4af   :  { %v1336_v50 = vrot.slane %v1335_v48, 2 }
 0x4b0   :  { %v1165_v51 = vadd.f32 %v1164_v49, %v1163_v47 }
 0x4b1   :  { %v1337_v52 = vadd.f32 %v1336_v50, %v1335_v48 }
 0x4b2   :  { %v1166_v53 = vrot.slane %v1165_v51, 2 }
 0x4b3   :  { %v1338_v54 = vrot.slane %v1337_v52, 1 }
 0x4b4   :  { %v1167_v55 = vadd.f32 %v1166_v53, %v1165_v51 }
 0x4b5   :  { %v1339_v56 = vadd.f32 %v1338_v54, %v1337_v52 }
 0x4b6   :  { %v1168_v57 = vrot.slane %v1167_v55, 1 }
 0x4b7   :  { %v1340_v58 = vmul.f32 0.03125, %v1339_v56 }
 0x4b8   :  { %v1169_v59 = vadd.f32 %v1168_v57, %v1167_v55 }
 0x4b9   :  { %v1341_v60 = vadd.f32 1e-05, %v1340_v58 }
 0x4ba   :  { %v1170_v61 = vmul.f32 0.03125, %v1169_v59 }
 0x4bb   :  { %1964 = vrsqrt.f32 %v1341_v60 }
 0x4bc   :  { %v1171_v62 = vadd.f32 1e-05, %v1170_v61 }
 0x4be   :  { %1966 = vrsqrt.f32 %v1171_v62 }
 0x4c5   :  { %v1965_v0 = vpop.eup %1964 }
 0x4c6   :  { %v1344_v3 = vmul.f32 %v1965_v0, %v1320_v45  ;;  %v1345_v26 = vmul.f32 %v1965_v0, %v1321_v14  ;;  %v1343_v4 = vmul.f32 %v1965_v0, %v1319_v25  ;;  %v1346_v5 = vmul.f32 %v1965_v0, %v1322_v20  ;;  %v1580_v25 = vld [vmem:[%s2488_s2 + $0x8] ss:$0 sm:$0xff] }
 0x4c8   :  { %v1967_v6 = vpop.eup %1966  ;;  %v1352_v9 = vmul.f32 %v1587_v63, %v1344_v3  ;;  %v1353_v38 = vmul.f32 %v1587_v63, %v1345_v26  ;;  %v1351_v11 = vmul.f32 %v1587_v63, %v1343_v4  ;;  %v1354_v12 = vmul.f32 %v1587_v63, %v1346_v5 }
 0x4c9   :  { %v1174_v15 = vmul.f32 %v1967_v6, %v1150_v13  ;;  %v1176_v18 = vmul.f32 %v1967_v6, %v1152_v2  ;;  %v1173_v44 = vmul.f32 %v1967_v6, %v1149_v8  ;;  %v1175_v19 = vmul.f32 %v1967_v6, %v1151_v28 }
 0x4ca   :  { %v1360_v22 = vadd.f32 %v1588_v1, %v1352_v9  ;;  %v1361_v23 = vadd.f32 %v1588_v1, %v1353_v38  ;;  %v1359_v24 = vadd.f32 %v1588_v1, %v1351_v11  ;;  %v1362_v27 = vadd.f32 %v1588_v1, %v1354_v12  ;;  %v1594_v9 = vld [vmem:[%s2488_s2 + $0xd] ss:$0 sm:$0xff]  ;;  %v1595_v38 = vld [vmem:[%s2488_s2 + $0xe] ss:$0 sm:$0xff] }
 0x4cb   :  { %v1182_v45 = vmul.f32 %v1579_v10, %v1174_v15  ;;  %v1184_v14 = vmul.f32 %v1579_v10, %v1176_v18  ;;  %v1181_v20 = vmul.f32 %v1579_v10, %v1173_v44  ;;  %v1183_v21 = vmul.f32 %v1579_v10, %v1175_v19 }
 0x4cd   :  { %v1190_v30 = vadd.f32 %v1580_v25, %v1182_v45  ;;  %v1192_v7 = vadd.f32 %v1580_v25, %v1184_v14  ;;  %v1189_v31 = vadd.f32 %v1580_v25, %v1181_v20  ;;  %v1191_v32 = vadd.f32 %v1580_v25, %v1183_v21 }
 0x4cf   :  { %v1363_v13 = vadd.f32 %v1359_v24, %v1189_v31  ;;  %v1364_v2 = vadd.f32 %v1360_v22, %v1190_v30  ;;  %v1365_v8 = vadd.f32 %v1361_v23, %v1191_v32  ;;  %v1366_v28 = vadd.f32 %v1362_v27, %v1192_v7 }
 0x4d1   :  { %v1367_v16 = vmax.f32 %v1363_v13, 0.0  ;;  %v1368_v33 = vmax.f32 %v1364_v2, 0.0  ;;  %v1369_v17 = vmax.f32 %v1365_v8, 0.0  ;;  %v1370_v35 = vmax.f32 %v1366_v28, 0.0 }
 0x4d3   :  { %1790 = vmatprep.mubr.msk.f32.mxu1 %vm1134_vm0, %v1367_v16 }
 0x4d4   :  { %1791 = vmatmul.mubr.msk.f32.vlgmr.msra.gmra.mrb[20].mxu1 %vm1134_vm0, %v1368_v33 }
 0x4d5   :  { %1793 = vmatprep.mubr.msk.f32.mxu1 %vm1134_vm0, %v1369_v17 }
 0x4d8   :  { %1794 = vmatmul.mubr.msk.f32.gmra.mrb[22].mxu1 %vm1134_vm0, %v1370_v35 }
 0x5a7   :  { %v1792_v36 = vpop.f32.mrb[20].mxu1 }
 0x5a8   :  { %v1458_v34 = vpop.f32.mrb[21].mxu1  ;;  %v1464_v40 = vadd.f32 %v1792_v36, %v1589_v39 }
 0x5a9   :  { %v1459_v41 = vadd.f32 %v1589_v39, %v1458_v34 }
 0x5aa   :  { %v1482_v46 = vsel %vm259_vm9, %v1464_v40, 0.0 }
 0x5ab   :  { %v1795_v42 = vpop.f32.mrb[22].mxu1  ;;  %v1477_v49 = vsel %vm259_vm9, %v1459_v41, 0.0 }
 0x5ac   :  { %v1474_v37 = vadd.f32 %v1795_v42, %v1589_v39  ;;  %v1468_v29 = vpop.f32.mrb[23].mxu1 }
 0x5ad   :  { %v1469_v43 = vadd.f32 %v1589_v39, %v1468_v29 }
 0x5ae   :  { %v1483_v47 = vsel %vm259_vm9, %v1474_v37, 0.0 }
 0x5af   :  { %v1484_v48 = vadd.f32 %v1483_v47, %v1482_v46  ;;  %v1478_v50 = vsel %vm259_vm9, %v1469_v43, 0.0 }
 0x5b0   :  { %v1479_v51 = vadd.f32 %v1478_v50, %v1477_v49 }
 0x5b1   :  { %1485 = vadd.xlane.f32.xlu0 %v1484_v48 }
 0x5b2   :  { %1480 = vadd.xlane.f32.xlu1 %v1479_v51 }
 0x63e   :  { %v1486_v52 = vpop.xlane.xlu0 %1485 }
 0x63f   :  { %v1489_v53 = vmul.f32 0.083333336, %v1486_v52  ;;  %v1481_v54 = vpop.xlane.xlu1 %1480 }
 0x640   :  { %v1488_v55 = vmul.f32 0.083333336, %v1481_v54 }
 0x641   :  { %v1491_v56 = vsub.f32 %v1464_v40, %v1489_v53  ;;  %v1493_v57 = vsub.f32 %v1474_v37, %v1489_v53 }
 0x642   :  { %v1490_v58 = vsub.f32 %v1459_v41, %v1488_v55  ;;  %v1492_v59 = vsub.f32 %v1469_v43, %v1488_v55 }
 0x643   :  { %v1495_v60 = vmul.f32 %v1491_v56, %v1491_v56  ;;  %v1497_v61 = vmul.f32 %v1493_v57, %v1493_v57 }
 0x644   :  { %v1494_v62 = vmul.f32 %v1490_v58, %v1490_v58  ;;  %v1496_v0 = vmul.f32 %v1492_v59, %v1492_v59 }
 0x645   :  { %v1503_v63 = vsel %vm259_vm9, %v1495_v60, 0.0  ;;  %v1504_v3 = vsel %vm259_vm9, %v1497_v61, 0.0 }
 0x646   :  { %v1505_v26 = vadd.f32 %v1504_v3, %v1503_v63  ;;  %v1498_v4 = vsel %vm259_vm9, %v1494_v62, 0.0  ;;  %v1499_v5 = vsel %vm259_vm9, %v1496_v0, 0.0 }
 0x647   :  { %v1500_v6 = vadd.f32 %v1499_v5, %v1498_v4 }
 0x648   :  { %1506 = vadd.xlane.f32.xlu1 %v1505_v26 }
 0x649   :  { %1501 = vadd.xlane.f32.xlu0 %v1500_v6 }
 0x659   :  { %1528 = vbcast.lane.b32.xlu1 %v1594_v9, 264 }
 0x65d   :  { %1540 = vbcast.lane.b32.xlu1 %v1595_v38, 256 }
 0x65f   :  { %1524 = vbcast.lane.b32.xlu0 %v1594_v9, 256 }
 0x663   :  { %1544 = vbcast.lane.b32.xlu0 %v1595_v38, 264 }
 0x6d5   :  { %v1507_v10 = vpop.xlane.xlu1 %1506 }
 0x6d6   :  { %v1509_v11 = vmul.f32 0.083333336, %v1507_v10  ;;  %v1502_v12 = vpop.xlane.xlu0 %1501 }
 0x6d7   :  { %v1508_v1 = vmul.f32 0.083333336, %v1502_v12 }
 0x6d8   :  { %v1511_v15 = vadd.f32 1e-05, %v1509_v11 }
 0x6d9   :  { %v1510_v18 = vadd.f32 1e-05, %v1508_v1  ;;  %v1529_v19 = vpop.permute.xlu1 %1528 }
 0x6da   :  { %1968 = vrsqrt.f32 %v1511_v15  ;;  %v1525_v44 = vpop.permute.xlu0 %1524 }
 0x6db   :  { %1970 = vrsqrt.f32 %v1510_v18 }
 0x6dd   :  { %v1541_v30 = vpop.permute.xlu1 %1540 }
 0x6de   :  { %v1545_v23 = vpop.permute.xlu0 %1544 }
 0x6e4   :  { %v1969_v25 = vpop.eup %1968 }
 0x6e5   :  { %v1971_v45 = vpop.eup %1970  ;;  %v1515_v14 = vmul.f32 %v1969_v25, %v1491_v56  ;;  %v1517_v20 = vmul.f32 %v1969_v25, %v1493_v57 }
 0x6e6   :  { %v1514_v21 = vmul.f32 %v1971_v45, %v1490_v58  ;;  %v1516_v22 = vmul.f32 %v1971_v45, %v1492_v59 }
 0x6e7   :  { %v1531_v24 = vmul.f32 %v1529_v19, %v1515_v14  ;;  %v1533_v27 = vmul.f32 %v1529_v19, %v1517_v20 }
 0x6e8   :  { %v1530_v7 = vmul.f32 %v1525_v44, %v1514_v21  ;;  %v1532_v31 = vmul.f32 %v1525_v44, %v1516_v22 }
 0x6e9   :  { %v1547_v32 = vadd.f32 %v1545_v23, %v1531_v24  ;;  %v1549_v13 = vadd.f32 %v1545_v23, %v1533_v27 }
 0x6ea   :  { %v1546_v2 = vadd.f32 %v1541_v30, %v1530_v7  ;;  %v1548_v8 = vadd.f32 %v1541_v30, %v1532_v31 }
 0x6eb   :  { %1551 = vst.msk [vmem:[%s2489_s3 + $0x8] sm:$0xff] %vm259_vm9, %v1547_v32  ;;  %1553 = vst.msk [vmem:[%s2489_s3 + $0x18] sm:$0xff] %vm259_vm9, %v1549_v13 }
 0x6ec   :  { %1550 = vst.msk [vmem:[%s2489_s3] sm:$0xff] %vm259_vm9, %v1546_v2  ;;  %1552 = vst.msk [vmem:[%s2489_s3 + $0x10] sm:$0xff] %vm259_vm9, %v1548_v8 }
 0x6ed   :  { %1558 = vsyncpa [#allocation3], 1 }

</bundles_post_ra>
